<compile_context>
chip_gen: v7x
topology: tpu7x:2x2x1
jax: 0.10.0
libtpu: 0.0.40
codegen_flags: <defaults>
</compile_context>

<pallas_src>
import math

import jax
import jax.numpy as jnp
from jax import lax
from jax.experimental import pallas as pl
from jax.experimental.pallas import tpu as pltpu


def _largest_divisor_leq(n, cap):
    for d in range(min(n, cap), 0, -1):
        if n % d == 0:
            return d
    return 1


def _make_attn_kernel(S, P, hg, d_per_head, scale):
    """Per (head-group, batch) step: QKV column projection + per-head attention."""
    Dh = d_per_head
    T = P + S
    f32 = jnp.float32

    def kernel(x_ref, past_ref, wq_ref, bq_ref, wk_ref, bk_ref, wv_ref, bv_ref,
               ctx_ref, pres_ref, attn_ref):
        x = x_ref[...]                                                     # (S, D)

        # Column-blocked projections for this head group (weights already [in, out]).
        q = (jnp.dot(x, wq_ref[...], preferred_element_type=f32) + bq_ref[...]) * scale
        k = jnp.dot(x, wk_ref[...], preferred_element_type=f32) + bk_ref[...]
        v = jnp.dot(x, wv_ref[...], preferred_element_type=f32) + bv_ref[...]

        for hi in range(hg):                 # hg is small (<= 8); bounded unroll
            lo = hi * Dh
            kh = k[:, lo:lo + Dh]            # (S, Dh)
            vh = v[:, lo:lo + Dh]

            # Assemble presents = concat(past, new) directly in the output block (no concat op,
            # no separate bulk cache copy). HBM writeback of the full dense block is done by the
            # pipeline DMA; these are cheap VMEM-local stores.
            pres_ref[0, 0, hi, 0:P, :] = past_ref[0, 0, hi, :, :]
            pres_ref[0, 0, hi, P:T, :] = kh
            pres_ref[1, 0, hi, 0:P, :] = past_ref[1, 0, hi, :, :]
            pres_ref[1, 0, hi, P:T, :] = vh

            k_full = pres_ref[0, 0, hi, :, :]                              # (T, Dh)
            v_full = pres_ref[1, 0, hi, :, :]                              # (T, Dh)

            # scores over the full (past + new) key range in one matmul
            s = lax.dot_general(q[:, lo:lo + Dh], k_full,
                                (((1,), (1,)), ((), ())),
                                preferred_element_type=f32)                # (S, T)
            e = jnp.exp(s - jnp.max(s, axis=-1, keepdims=True))
            p = e / jnp.sum(e, axis=-1, keepdims=True)                     # exact softmax

            attn_ref[0, hi, :, :] = p                                      # one dense T-wide store
            ctx_ref[:, lo:lo + Dh] = jnp.dot(p, v_full, preferred_element_type=f32)

    return kernel


def _make_post_kernel(eps):
    """Per M-row-tile step: out-proj + residual + LN0 + FFN + residual + LN1."""
    f32 = jnp.float32

    def kernel(ctx_ref, x_ref, wo_ref, bo_ref, w1_ref, b1_ref, w2_ref, b2_ref,
               g0_ref, be0_ref, g1_ref, be1_ref, out_ref):
        x = x_ref[...]                                                     # (tm, D)
        attn_out = jnp.dot(ctx_ref[...], wo_ref[...], preferred_element_type=f32) + bo_ref[...]
        xr = x + attn_out

        mu = jnp.mean(xr, axis=-1, keepdims=True)
        var = jnp.mean((xr - mu) ** 2, axis=-1, keepdims=True)
        x1 = (xr - mu) * lax.rsqrt(var + eps) * g0_ref[...] + be0_ref[...]

        h1 = jnp.maximum(
            jnp.dot(x1, w1_ref[...], preferred_element_type=f32) + b1_ref[...], 0.0)
        x2 = jnp.dot(h1, w2_ref[...], preferred_element_type=f32) + b2_ref[...]
        xr = xr + x2

        mu = jnp.mean(xr, axis=-1, keepdims=True)
        var = jnp.mean((xr - mu) ** 2, axis=-1, keepdims=True)
        out_ref[...] = (xr - mu) * lax.rsqrt(var + eps) * g1_ref[...] + be1_ref[...]

    return kernel


def encoder_layer_gpt2(x, past, params, *, n_head, eps=1e-5):
    """x: [B, S, D] f32; past: [2, B, H, P, Dh] f32. Returns (out, presents, attn)."""
    B, S, D = x.shape
    two, Bp, H, P, Dh = past.shape
    assert two == 2 and Bp == B and H == n_head and Dh * n_head == D and P >= 1
    T = P + S
    M = B * S
    Dff = params["w1"].shape[0]
    scale = 1.0 / math.sqrt(Dh)

    # Heads per grid step: keep weight-column / context blocks ~128 lanes wide when possible.
    hg = _largest_divisor_leq(H, min(8, max(1, 128 // Dh)))
    gw = hg * Dh
    n_groups = H // hg

    # Pre-transpose PyTorch [out, in] weights to [in, out] once, outside the kernel.
    wq = params["wq"].T
    wk = params["wk"].T
    wv = params["wv"].T
    wo = params["wo"].T
    w1 = params["w1"].T          # (D, Dff)
    w2 = params["w2"].T          # (Dff, D)
    x2d = x.reshape(M, D)

    # --------------------------- Kernel A: QKV + attention --------------------------------------
    attn_kernel = _make_attn_kernel(S, P, hg, Dh, scale)

    in_specs_a = [
        pl.BlockSpec((S, D), lambda g, b: (b, 0)),                          # x rows for batch b
        pl.BlockSpec((2, 1, hg, P, Dh), lambda g, b: (0, b, g, 0, 0)),      # past KV block
        pl.BlockSpec((D, gw), lambda g, b: (0, g)),                         # wq columns
        pl.BlockSpec((1, gw), lambda g, b: (0, g)),                         # bq
        pl.BlockSpec((D, gw), lambda g, b: (0, g)),                         # wk columns
        pl.BlockSpec((1, gw), lambda g, b: (0, g)),                         # bk
        pl.BlockSpec((D, gw), lambda g, b: (0, g)),                         # wv columns
        pl.BlockSpec((1, gw), lambda g, b: (0, g)),                         # bv
    ]
    out_specs_a = [
        pl.BlockSpec((S, gw), lambda g, b: (b, g)),                         # context columns
        pl.BlockSpec((2, 1, hg, T, Dh), lambda g, b: (0, b, g, 0, 0)),      # presents block
        pl.BlockSpec((1, hg, S, T), lambda g, b: (b, g, 0, 0)),             # attention probs
    ]
    out_shapes_a = (
        jax.ShapeDtypeStruct((M, D), jnp.float32),
        jax.ShapeDtypeStruct((2, B, H, T, Dh), jnp.float32),
        jax.ShapeDtypeStruct((B, H, S, T), jnp.float32),
    )

    ctx, presents, attn = pl.pallas_call(
        attn_kernel,
        out_shape=out_shapes_a,
        grid=(n_groups, B),
        in_specs=in_specs_a,
        out_specs=out_specs_a,
        compiler_params=pltpu.CompilerParams(
            dimension_semantics=("parallel", "parallel")),
    )(x2d, past, wq, params["bq"], wk, params["bk"], wv, params["bv"])

    # --------------------------- Kernel B: out-proj + FFN + LayerNorms --------------------------
    if M % 256 == 0:
        tm = 256
    elif M % 128 == 0:
        tm = 128
    else:
        tm = M

    post_kernel = _make_post_kernel(eps)

    def _res(shape):
        n = len(shape)
        return pl.BlockSpec(shape, lambda i, n=n: (0,) * n)                 # resident across tiles

    in_specs_b = [
        pl.BlockSpec((tm, D), lambda i: (i, 0)),                            # context tile
        pl.BlockSpec((tm, D), lambda i: (i, 0)),                            # residual input tile
        _res((D, D)), _res((1, D)),                                         # wo, bo
        _res((D, Dff)), _res((1, Dff)),                                     # w1, b1
        _res((Dff, D)), _res((1, D)),                                       # w2, b2
        _res((1, D)), _res((1, D)),                                         # gamma0, beta0
        _res((1, D)), _res((1, D)),                                         # gamma1, beta1
    ]

    out2d = pl.pallas_call(
        post_kernel,
        out_shape=jax.ShapeDtypeStruct((M, D), jnp.float32),
        grid=(M // tm,),
        in_specs=in_specs_b,
        out_specs=pl.BlockSpec((tm, D), lambda i: (i, 0)),
        compiler_params=pltpu.CompilerParams(dimension_semantics=("parallel",)),
    )(ctx, x2d, wo, params["bo"], w1, params["b1"], w2, params["b2"],
      params["g0"], params["be0"], params["g1"], params["be1"])

    return out2d.reshape(B, S, D), presents, attn


def _reference(x, past, params, *, n_head, eps=1e-5):
    """Pure-JAX reference replicating the PyTorch module (eval mode)."""
    B, S, D = x.shape
    Dh = D // n_head
    hp = jax.lax.Precision.HIGHEST

    def lin(a, w, b):
        return jnp.einsum("...i,oi->...o", a, w, precision=hp) + b[0]

    def heads(t):
        return t.reshape(B, S, n_head, Dh).transpose(0, 2, 1, 3)

    q = heads(lin(x, params["wq"], params["bq"]))
    k = heads(lin(x, params["wk"], params["bk"]))
    v = heads(lin(x, params["wv"], params["bv"]))
    k = jnp.concatenate([past[0], k], axis=-2)
    v = jnp.concatenate([past[1], v], axis=-2)
    presents = jnp.stack([k, v])
    scores = jnp.einsum("bhqd,bhkd->bhqk", q, k, precision=hp) / math.sqrt(Dh)
    attn = jax.nn.softmax(scores, axis=-1)
    ctx = jnp.einsum("bhqk,bhkd->bhqd", attn, v, precision=hp)
    ctx = ctx.transpose(0, 2, 1, 3).reshape(B, S, D)
    xr = x + lin(ctx, params["wo"], params["bo"])

    def ln(a, g, b):
        mu = a.mean(-1, keepdims=True)
        var = ((a - mu) ** 2).mean(-1, keepdims=True)
        return (a - mu) / jnp.sqrt(var + eps) * g[0] + b[0]

    y = ln(xr, params["g0"], params["be0"])
    y = lin(jnp.maximum(lin(y, params["w1"], params["b1"]), 0.0), params["w2"], params["b2"])
    xr = xr + y
    return ln(xr, params["g1"], params["be1"]), presents, attn


if __name__ == "__main__":
    B, S, D, H, P, Dff = 2, 8, 32, 4, 8, 64
    Dh = D // H

    key = jax.random.PRNGKey(0)
    ks = jax.random.split(key, 16)
    sc = 0.05

    params = {
        "wq": sc * jax.random.normal(ks[0], (D, D), jnp.float32),
        "bq": sc * jax.random.normal(ks[1], (1, D), jnp.float32),
        "wk": sc * jax.random.normal(ks[2], (D, D), jnp.float32),
        "bk": sc * jax.random.normal(ks[3], (1, D), jnp.float32),
        "wv": sc * jax.random.normal(ks[4], (D, D), jnp.float32),
        "bv": sc * jax.random.normal(ks[5], (1, D), jnp.float32),
        "wo": sc * jax.random.normal(ks[6], (D, D), jnp.float32),
        "bo": sc * jax.random.normal(ks[7], (1, D), jnp.float32),
        "w1": sc * jax.random.normal(ks[8], (Dff, D), jnp.float32),
        "b1": sc * jax.random.normal(ks[9], (1, Dff), jnp.float32),
        "w2": sc * jax.random.normal(ks[10], (D, Dff), jnp.float32),
        "b2": sc * jax.random.normal(ks[11], (1, D), jnp.float32),
        "g0": jnp.ones((1, D), jnp.float32),
        "be0": jnp.zeros((1, D), jnp.float32),
        "g1": jnp.ones((1, D), jnp.float32),
        "be1": jnp.zeros((1, D), jnp.float32),
    }

    x = jax.random.normal(ks[12], (B, S, D), jnp.float32)
    past = jax.random.normal(ks[13], (2, B, H, P, Dh), jnp.float32)

    out, presents, attn = encoder_layer_gpt2(x, past, params, n_head=H)
    jax.block_until_ready((out, presents, attn))

    out_r, presents_r, attn_r = _reference(x, past, params, n_head=H)

    assert out.shape == (B, S, D)
    assert presents.shape == (2, B, H, P + S, Dh)
    assert attn.shape == (B, H, S, P + S)
    assert jnp.allclose(out, out_r, atol=2e-3, rtol=2e-3)
    assert jnp.allclose(presents, presents_r, atol=2e-3, rtol=2e-3)
    assert jnp.allclose(attn, attn_r, atol=2e-3, rtol=2e-3)

    print("KERNEL_OK")
</pallas_src>

<mosaic_0001>
module attributes {stable_mosaic.version = 11 : i64} {
  func.func @kernel(%arg0: i32, %arg1: i32, %arg2: memref<8x32xf32, #tpu.memory_space<vmem>>, %arg3: memref<2x1x4x8x8xf32, #tpu.memory_space<vmem>>, %arg4: memref<32x32xf32, #tpu.memory_space<vmem>>, %arg5: memref<1x32xf32, #tpu.memory_space<vmem>>, %arg6: memref<32x32xf32, #tpu.memory_space<vmem>>, %arg7: memref<1x32xf32, #tpu.memory_space<vmem>>, %arg8: memref<32x32xf32, #tpu.memory_space<vmem>>, %arg9: memref<1x32xf32, #tpu.memory_space<vmem>>, %arg10: memref<8x32xf32, #tpu.memory_space<vmem>>, %arg11: memref<2x1x4x16x8xf32, #tpu.memory_space<vmem>>, %arg12: memref<1x4x8x16xf32, #tpu.memory_space<vmem>>) attributes {dimension_semantics = [#tpu.dimension_semantics<parallel>, #tpu.dimension_semantics<parallel>], iteration_bounds = array<i64: 1, 2>, scalar_prefetch = 0 : i64, scratch_operands = 0 : i64, tpu.core_type = #tpu.core_type<tc>, window_params = [{transform_indices = @transform_0, window_bounds = array<i64: 8, 32>}, {transform_indices = @transform_1, window_bounds = array<i64: 2, 1, 4, 8, 8>}, {transform_indices = @transform_2, window_bounds = array<i64: 32, 32>}, {transform_indices = @transform_3, window_bounds = array<i64: 1, 32>}, {transform_indices = @transform_4, window_bounds = array<i64: 32, 32>}, {transform_indices = @transform_5, window_bounds = array<i64: 1, 32>}, {transform_indices = @transform_6, window_bounds = array<i64: 32, 32>}, {transform_indices = @transform_7, window_bounds = array<i64: 1, 32>}, {transform_indices = @transform_8, window_bounds = array<i64: 8, 32>}, {transform_indices = @transform_9, window_bounds = array<i64: 2, 1, 4, 16, 8>}, {transform_indices = @transform_10, window_bounds = array<i64: 1, 4, 8, 16>}]} {
    %c0 = arith.constant 0 : index
    %c0_0 = arith.constant 0 : index
    %0 = vector.load %arg2[%c0, %c0_0] : memref<8x32xf32, #tpu.memory_space<vmem>>, vector<8x32xf32>
    %c0_1 = arith.constant 0 : index
    %c0_2 = arith.constant 0 : index
    %1 = vector.load %arg4[%c0_1, %c0_2] : memref<32x32xf32, #tpu.memory_space<vmem>>, vector<32x32xf32>
    %cst = arith.constant dense<0.000000e+00> : vector<8x32xf32>
    %2 = tpu.matmul %0, %1, %cst {dimension_numbers = #tpu.dot_dimension_numbers<[1], [0], [0], [1], [0, 0, 1, 1], [], []>} : vector<8x32xf32>, vector<32x32xf32>, vector<8x32xf32> -> vector<8x32xf32>
    %c0_3 = arith.constant 0 : index
    %c0_4 = arith.constant 0 : index
    %3 = vector.load %arg5[%c0_3, %c0_4] : memref<1x32xf32, #tpu.memory_space<vmem>>, vector<1x32xf32>
    %4 = vector.broadcast %3 : vector<1x32xf32> to vector<8x32xf32>
    %5 = arith.addf %2, %4 : vector<8x32xf32>
    %cst_5 = arith.constant 0.353553385 : f32
    %6 = vector.broadcast %cst_5 : f32 to vector<8x32xf32>
    %7 = arith.mulf %5, %6 : vector<8x32xf32>
    %c0_6 = arith.constant 0 : index
    %c0_7 = arith.constant 0 : index
    %8 = vector.load %arg6[%c0_6, %c0_7] : memref<32x32xf32, #tpu.memory_space<vmem>>, vector<32x32xf32>
    %cst_8 = arith.constant dense<0.000000e+00> : vector<8x32xf32>
    %9 = tpu.matmul %0, %8, %cst_8 {dimension_numbers = #tpu.dot_dimension_numbers<[1], [0], [0], [1], [0, 0, 1, 1], [], []>} : vector<8x32xf32>, vector<32x32xf32>, vector<8x32xf32> -> vector<8x32xf32>
    %c0_9 = arith.constant 0 : index
    %c0_10 = arith.constant 0 : index
    %10 = vector.load %arg7[%c0_9, %c0_10] : memref<1x32xf32, #tpu.memory_space<vmem>>, vector<1x32xf32>
    %11 = vector.broadcast %10 : vector<1x32xf32> to vector<8x32xf32>
    %12 = arith.addf %9, %11 : vector<8x32xf32>
    %c0_11 = arith.constant 0 : index
    %c0_12 = arith.constant 0 : index
    %13 = vector.load %arg8[%c0_11, %c0_12] : memref<32x32xf32, #tpu.memory_space<vmem>>, vector<32x32xf32>
    %cst_13 = arith.constant dense<0.000000e+00> : vector<8x32xf32>
    %14 = tpu.matmul %0, %13, %cst_13 {dimension_numbers = #tpu.dot_dimension_numbers<[1], [0], [0], [1], [0, 0, 1, 1], [], []>} : vector<8x32xf32>, vector<32x32xf32>, vector<8x32xf32> -> vector<8x32xf32>
    %c0_14 = arith.constant 0 : index
    %c0_15 = arith.constant 0 : index
    %15 = vector.load %arg9[%c0_14, %c0_15] : memref<1x32xf32, #tpu.memory_space<vmem>>, vector<1x32xf32>
    %16 = vector.broadcast %15 : vector<1x32xf32> to vector<8x32xf32>
    %17 = arith.addf %14, %16 : vector<8x32xf32>
    %18 = vector.extract_strided_slice %12 {offsets = [0, 0], sizes = [8, 8], strides = [1, 1]} : vector<8x32xf32> to vector<8x8xf32>
    %19 = vector.extract_strided_slice %17 {offsets = [0, 0], sizes = [8, 8], strides = [1, 1]} : vector<8x32xf32> to vector<8x8xf32>
    %c0_16 = arith.constant 0 : index
    %c0_17 = arith.constant 0 : index
    %c0_18 = arith.constant 0 : index
    %c0_19 = arith.constant 0 : index
    %c0_20 = arith.constant 0 : index
    %20 = vector.load %arg3[%c0_16, %c0_17, %c0_18, %c0_19, %c0_20] : memref<2x1x4x8x8xf32, #tpu.memory_space<vmem>>, vector<1x1x1x8x8xf32>
    %21 = vector.shape_cast %20 : vector<1x1x1x8x8xf32> to vector<8x8xf32>
    %c0_21 = arith.constant 0 : index
    %c0_22 = arith.constant 0 : index
    %c0_23 = arith.constant 0 : index
    %c0_24 = arith.constant 0 : index
    %c0_25 = arith.constant 0 : index
    %22 = vector.load %arg11[%c0_21, %c0_22, %c0_23, %c0_24, %c0_25] : memref<2x1x4x16x8xf32, #tpu.memory_space<vmem>>, vector<1x1x1x8x8xf32>
    %23 = vector.shape_cast %22 : vector<1x1x1x8x8xf32> to vector<8x8xf32>
    %24 = vector.shape_cast %21 : vector<8x8xf32> to vector<1x1x1x8x8xf32>
    tpu.vector_store %arg11[%c0_21, %c0_22, %c0_23, %c0_24, %c0_25], %24 {strides = array<i32>} : memref<2x1x4x16x8xf32, #tpu.memory_space<vmem>>, vector<1x1x1x8x8xf32>,
    %c0_26 = arith.constant 0 : index
    %c0_27 = arith.constant 0 : index
    %c0_28 = arith.constant 0 : index
    %c8 = arith.constant 8 : index
    %c0_29 = arith.constant 0 : index
    %25 = vector.load %arg11[%c0_26, %c0_27, %c0_28, %c8, %c0_29] : memref<2x1x4x16x8xf32, #tpu.memory_space<vmem>>, vector<1x1x1x8x8xf32>
    %26 = vector.shape_cast %25 : vector<1x1x1x8x8xf32> to vector<8x8xf32>
    %27 = vector.shape_cast %18 : vector<8x8xf32> to vector<1x1x1x8x8xf32>
    tpu.vector_store %arg11[%c0_26, %c0_27, %c0_28, %c8, %c0_29], %27 {strides = array<i32>} : memref<2x1x4x16x8xf32, #tpu.memory_space<vmem>>, vector<1x1x1x8x8xf32>,
    %c1 = arith.constant 1 : index
    %c0_30 = arith.constant 0 : index
    %c0_31 = arith.constant 0 : index
    %c0_32 = arith.constant 0 : index
    %c0_33 = arith.constant 0 : index
    %28 = vector.load %arg3[%c1, %c0_30, %c0_31, %c0_32, %c0_33] : memref<2x1x4x8x8xf32, #tpu.memory_space<vmem>>, vector<1x1x1x8x8xf32>
    %29 = vector.shape_cast %28 : vector<1x1x1x8x8xf32> to vector<8x8xf32>
    %c1_34 = arith.constant 1 : index
    %c0_35 = arith.constant 0 : index
    %c0_36 = arith.constant 0 : index
    %c0_37 = arith.constant 0 : index
    %c0_38 = arith.constant 0 : index
    %30 = vector.load %arg11[%c1_34, %c0_35, %c0_36, %c0_37, %c0_38] : memref<2x1x4x16x8xf32, #tpu.memory_space<vmem>>, vector<1x1x1x8x8xf32>
    %31 = vector.shape_cast %30 : vector<1x1x1x8x8xf32> to vector<8x8xf32>
    %32 = vector.shape_cast %29 : vector<8x8xf32> to vector<1x1x1x8x8xf32>
    tpu.vector_store %arg11[%c1_34, %c0_35, %c0_36, %c0_37, %c0_38], %32 {strides = array<i32>} : memref<2x1x4x16x8xf32, #tpu.memory_space<vmem>>, vector<1x1x1x8x8xf32>,
    %c1_39 = arith.constant 1 : index
    %c0_40 = arith.constant 0 : index
    %c0_41 = arith.constant 0 : index
    %c8_42 = arith.constant 8 : index
    %c0_43 = arith.constant 0 : index
    %33 = vector.load %arg11[%c1_39, %c0_40, %c0_41, %c8_42, %c0_43] : memref<2x1x4x16x8xf32, #tpu.memory_space<vmem>>, vector<1x1x1x8x8xf32>
    %34 = vector.shape_cast %33 : vector<1x1x1x8x8xf32> to vector<8x8xf32>
    %35 = vector.shape_cast %19 : vector<8x8xf32> to vector<1x1x1x8x8xf32>
    tpu.vector_store %arg11[%c1_39, %c0_40, %c0_41, %c8_42, %c0_43], %35 {strides = array<i32>} : memref<2x1x4x16x8xf32, #tpu.memory_space<vmem>>, vector<1x1x1x8x8xf32>,
    %c0_44 = arith.constant 0 : index
    %c0_45 = arith.constant 0 : index
    %c0_46 = arith.constant 0 : index
    %c0_47 = arith.constant 0 : index
    %c0_48 = arith.constant 0 : index
    %36 = vector.load %arg11[%c0_44, %c0_45, %c0_46, %c0_47, %c0_48] : memref<2x1x4x16x8xf32, #tpu.memory_space<vmem>>, vector<1x1x1x16x8xf32>
    %37 = vector.shape_cast %36 : vector<1x1x1x16x8xf32> to vector<16x8xf32>
    %c1_49 = arith.constant 1 : index
    %c0_50 = arith.constant 0 : index
    %c0_51 = arith.constant 0 : index
    %c0_52 = arith.constant 0 : index
    %c0_53 = arith.constant 0 : index
    %38 = vector.load %arg11[%c1_49, %c0_50, %c0_51, %c0_52, %c0_53] : memref<2x1x4x16x8xf32, #tpu.memory_space<vmem>>, vector<1x1x1x16x8xf32>
    %39 = vector.shape_cast %38 : vector<1x1x1x16x8xf32> to vector<16x8xf32>
    %40 = vector.extract_strided_slice %7 {offsets = [0, 0], sizes = [8, 8], strides = [1, 1]} : vector<8x32xf32> to vector<8x8xf32>
    %cst_54 = arith.constant dense<0.000000e+00> : vector<8x16xf32>
    %41 = tpu.matmul %40, %37, %cst_54 {dimension_numbers = #tpu.dot_dimension_numbers<[1], [1], [0], [0], [0, 0, 1, 0], [], []>} : vector<8x8xf32>, vector<16x8xf32>, vector<8x16xf32> -> vector<8x16xf32>
    %cst_55 = arith.constant dense<0xFF800000> : vector<8xf32>
    %42 = vector.multi_reduction <maximumf>, %41, %cst_55 [1] : vector<8x16xf32> to vector<8xf32>
    %43 = vector.shape_cast %42 : vector<8xf32> to vector<8x1xf32>
    %44 = vector.broadcast %43 : vector<8x1xf32> to vector<8x16xf32>
    %45 = arith.subf %41, %44 : vector<8x16xf32>
    %46 = math.exp %45 : vector<8x16xf32>
    %cst_56 = arith.constant dense<0.000000e+00> : vector<8xf32>
    %47 = vector.multi_reduction <add>, %46, %cst_56 [1] : vector<8x16xf32> to vector<8xf32>
    %48 = vector.shape_cast %47 : vector<8xf32> to vector<8x1xf32>
    %49 = vector.broadcast %48 : vector<8x1xf32> to vector<8x16xf32>
    %50 = arith.divf %46, %49 : vector<8x16xf32>
    %c0_57 = arith.constant 0 : index
    %c0_58 = arith.constant 0 : index
    %c0_59 = arith.constant 0 : index
    %c0_60 = arith.constant 0 : index
    %51 = vector.load %arg12[%c0_57, %c0_58, %c0_59, %c0_60] : memref<1x4x8x16xf32, #tpu.memory_space<vmem>>, vector<1x1x8x16xf32>
    %52 = vector.shape_cast %51 : vector<1x1x8x16xf32> to vector<8x16xf32>
    %53 = vector.shape_cast %50 : vector<8x16xf32> to vector<1x1x8x16xf32>
    tpu.vector_store %arg12[%c0_57, %c0_58, %c0_59, %c0_60], %53 {strides = array<i32>} : memref<1x4x8x16xf32, #tpu.memory_space<vmem>>, vector<1x1x8x16xf32>,
    %cst_61 = arith.constant dense<0.000000e+00> : vector<8x8xf32>
    %54 = tpu.matmul %50, %39, %cst_61 {dimension_numbers = #tpu.dot_dimension_numbers<[1], [0], [0], [1], [0, 0, 1, 1], [], []>} : vector<8x16xf32>, vector<16x8xf32>, vector<8x8xf32> -> vector<8x8xf32>
    %c0_62 = arith.constant 0 : index
    %c0_63 = arith.constant 0 : index
    %55 = vector.load %arg10[%c0_62, %c0_63] : memref<8x32xf32, #tpu.memory_space<vmem>>, vector<8x8xf32>
    tpu.vector_store %arg10[%c0_62, %c0_63], %54 {strides = array<i32>} : memref<8x32xf32, #tpu.memory_space<vmem>>, vector<8x8xf32>,
    %56 = vector.extract_strided_slice %12 {offsets = [0, 8], sizes = [8, 8], strides = [1, 1]} : vector<8x32xf32> to vector<8x8xf32>
    %57 = vector.extract_strided_slice %17 {offsets = [0, 8], sizes = [8, 8], strides = [1, 1]} : vector<8x32xf32> to vector<8x8xf32>
    %c0_64 = arith.constant 0 : index
    %c0_65 = arith.constant 0 : index
    %c1_66 = arith.constant 1 : index
    %c0_67 = arith.constant 0 : index
    %c0_68 = arith.constant 0 : index
    %58 = vector.load %arg3[%c0_64, %c0_65, %c1_66, %c0_67, %c0_68] : memref<2x1x4x8x8xf32, #tpu.memory_space<vmem>>, vector<1x1x1x8x8xf32>
    %59 = vector.shape_cast %58 : vector<1x1x1x8x8xf32> to vector<8x8xf32>
    %c0_69 = arith.constant 0 : index
    %c0_70 = arith.constant 0 : index
    %c1_71 = arith.constant 1 : index
    %c0_72 = arith.constant 0 : index
    %c0_73 = arith.constant 0 : index
    %60 = vector.load %arg11[%c0_69, %c0_70, %c1_71, %c0_72, %c0_73] : memref<2x1x4x16x8xf32, #tpu.memory_space<vmem>>, vector<1x1x1x8x8xf32>
    %61 = vector.shape_cast %60 : vector<1x1x1x8x8xf32> to vector<8x8xf32>
    %62 = vector.shape_cast %59 : vector<8x8xf32> to vector<1x1x1x8x8xf32>
    tpu.vector_store %arg11[%c0_69, %c0_70, %c1_71, %c0_72, %c0_73], %62 {strides = array<i32>} : memref<2x1x4x16x8xf32, #tpu.memory_space<vmem>>, vector<1x1x1x8x8xf32>,
    %c0_74 = arith.constant 0 : index
    %c0_75 = arith.constant 0 : index
    %c1_76 = arith.constant 1 : index
    %c8_77 = arith.constant 8 : index
    %c0_78 = arith.constant 0 : index
    %63 = vector.load %arg11[%c0_74, %c0_75, %c1_76, %c8_77, %c0_78] : memref<2x1x4x16x8xf32, #tpu.memory_space<vmem>>, vector<1x1x1x8x8xf32>
    %64 = vector.shape_cast %63 : vector<1x1x1x8x8xf32> to vector<8x8xf32>
    %65 = vector.shape_cast %56 : vector<8x8xf32> to vector<1x1x1x8x8xf32>
    tpu.vector_store %arg11[%c0_74, %c0_75, %c1_76, %c8_77, %c0_78], %65 {strides = array<i32>} : memref<2x1x4x16x8xf32, #tpu.memory_space<vmem>>, vector<1x1x1x8x8xf32>,
    %c1_79 = arith.constant 1 : index
    %c0_80 = arith.constant 0 : index
    %c1_81 = arith.constant 1 : index
    %c0_82 = arith.constant 0 : index
    %c0_83 = arith.constant 0 : index
    %66 = vector.load %arg3[%c1_79, %c0_80, %c1_81, %c0_82, %c0_83] : memref<2x1x4x8x8xf32, #tpu.memory_space<vmem>>, vector<1x1x1x8x8xf32>
    %67 = vector.shape_cast %66 : vector<1x1x1x8x8xf32> to vector<8x8xf32>
    %c1_84 = arith.constant 1 : index
    %c0_85 = arith.constant 0 : index
    %c1_86 = arith.constant 1 : index
    %c0_87 = arith.constant 0 : index
    %c0_88 = arith.constant 0 : index
    %68 = vector.load %arg11[%c1_84, %c0_85, %c1_86, %c0_87, %c0_88] : memref<2x1x4x16x8xf32, #tpu.memory_space<vmem>>, vector<1x1x1x8x8xf32>
    %69 = vector.shape_cast %68 : vector<1x1x1x8x8xf32> to vector<8x8xf32>
    %70 = vector.shape_cast %67 : vector<8x8xf32> to vector<1x1x1x8x8xf32>
    tpu.vector_store %arg11[%c1_84, %c0_85, %c1_86, %c0_87, %c0_88], %70 {strides = array<i32>} : memref<2x1x4x16x8xf32, #tpu.memory_space<vmem>>, vector<1x1x1x8x8xf32>,
    %c1_89 = arith.constant 1 : index
    %c0_90 = arith.constant 0 : index
    %c1_91 = arith.constant 1 : index
    %c8_92 = arith.constant 8 : index
    %c0_93 = arith.constant 0 : index
    %71 = vector.load %arg11[%c1_89, %c0_90, %c1_91, %c8_92, %c0_93] : memref<2x1x4x16x8xf32, #tpu.memory_space<vmem>>, vector<1x1x1x8x8xf32>
    %72 = vector.shape_cast %71 : vector<1x1x1x8x8xf32> to vector<8x8xf32>
    %73 = vector.shape_cast %57 : vector<8x8xf32> to vector<1x1x1x8x8xf32>
    tpu.vector_store %arg11[%c1_89, %c0_90, %c1_91, %c8_92, %c0_93], %73 {strides = array<i32>} : memref<2x1x4x16x8xf32, #tpu.memory_space<vmem>>, vector<1x1x1x8x8xf32>,
    %c0_94 = arith.constant 0 : index
    %c0_95 = arith.constant 0 : index
    %c1_96 = arith.constant 1 : index
    %c0_97 = arith.constant 0 : index
    %c0_98 = arith.constant 0 : index
    %74 = vector.load %arg11[%c0_94, %c0_95, %c1_96, %c0_97, %c0_98] : memref<2x1x4x16x8xf32, #tpu.memory_space<vmem>>, vector<1x1x1x16x8xf32>
    %75 = vector.shape_cast %74 : vector<1x1x1x16x8xf32> to vector<16x8xf32>
    %c1_99 = arith.constant 1 : index
    %c0_100 = arith.constant 0 : index
    %c1_101 = arith.constant 1 : index
    %c0_102 = arith.constant 0 : index
    %c0_103 = arith.constant 0 : index
    %76 = vector.load %arg11[%c1_99, %c0_100, %c1_101, %c0_102, %c0_103] : memref<2x1x4x16x8xf32, #tpu.memory_space<vmem>>, vector<1x1x1x16x8xf32>
    %77 = vector.shape_cast %76 : vector<1x1x1x16x8xf32> to vector<16x8xf32>
    %78 = vector.extract_strided_slice %7 {offsets = [0, 8], sizes = [8, 8], strides = [1, 1]} : vector<8x32xf32> to vector<8x8xf32>
    %cst_104 = arith.constant dense<0.000000e+00> : vector<8x16xf32>
    %79 = tpu.matmul %78, %75, %cst_104 {dimension_numbers = #tpu.dot_dimension_numbers<[1], [1], [0], [0], [0, 0, 1, 0], [], []>} : vector<8x8xf32>, vector<16x8xf32>, vector<8x16xf32> -> vector<8x16xf32>
    %cst_105 = arith.constant dense<0xFF800000> : vector<8xf32>
    %80 = vector.multi_reduction <maximumf>, %79, %cst_105 [1] : vector<8x16xf32> to vector<8xf32>
    %81 = vector.shape_cast %80 : vector<8xf32> to vector<8x1xf32>
    %82 = vector.broadcast %81 : vector<8x1xf32> to vector<8x16xf32>
    %83 = arith.subf %79, %82 : vector<8x16xf32>
    %84 = math.exp %83 : vector<8x16xf32>
    %cst_106 = arith.constant dense<0.000000e+00> : vector<8xf32>
    %85 = vector.multi_reduction <add>, %84, %cst_106 [1] : vector<8x16xf32> to vector<8xf32>
    %86 = vector.shape_cast %85 : vector<8xf32> to vector<8x1xf32>
    %87 = vector.broadcast %86 : vector<8x1xf32> to vector<8x16xf32>
    %88 = arith.divf %84, %87 : vector<8x16xf32>
    %c0_107 = arith.constant 0 : index
    %c1_108 = arith.constant 1 : index
    %c0_109 = arith.constant 0 : index
    %c0_110 = arith.constant 0 : index
    %89 = vector.load %arg12[%c0_107, %c1_108, %c0_109, %c0_110] : memref<1x4x8x16xf32, #tpu.memory_space<vmem>>, vector<1x1x8x16xf32>
    %90 = vector.shape_cast %89 : vector<1x1x8x16xf32> to vector<8x16xf32>
    %91 = vector.shape_cast %88 : vector<8x16xf32> to vector<1x1x8x16xf32>
    tpu.vector_store %arg12[%c0_107, %c1_108, %c0_109, %c0_110], %91 {strides = array<i32>} : memref<1x4x8x16xf32, #tpu.memory_space<vmem>>, vector<1x1x8x16xf32>,
    %cst_111 = arith.constant dense<0.000000e+00> : vector<8x8xf32>
    %92 = tpu.matmul %88, %77, %cst_111 {dimension_numbers = #tpu.dot_dimension_numbers<[1], [0], [0], [1], [0, 0, 1, 1], [], []>} : vector<8x16xf32>, vector<16x8xf32>, vector<8x8xf32> -> vector<8x8xf32>
    %c0_112 = arith.constant 0 : index
    %c8_113 = arith.constant 8 : index
    %93 = vector.load %arg10[%c0_112, %c8_113] : memref<8x32xf32, #tpu.memory_space<vmem>>, vector<8x8xf32>
    tpu.vector_store %arg10[%c0_112, %c8_113], %92 {strides = array<i32>} : memref<8x32xf32, #tpu.memory_space<vmem>>, vector<8x8xf32>,
    %94 = vector.extract_strided_slice %12 {offsets = [0, 16], sizes = [8, 8], strides = [1, 1]} : vector<8x32xf32> to vector<8x8xf32>
    %95 = vector.extract_strided_slice %17 {offsets = [0, 16], sizes = [8, 8], strides = [1, 1]} : vector<8x32xf32> to vector<8x8xf32>
    %c0_114 = arith.constant 0 : index
    %c0_115 = arith.constant 0 : index
    %c2 = arith.constant 2 : index
    %c0_116 = arith.constant 0 : index
    %c0_117 = arith.constant 0 : index
    %96 = vector.load %arg3[%c0_114, %c0_115, %c2, %c0_116, %c0_117] : memref<2x1x4x8x8xf32, #tpu.memory_space<vmem>>, vector<1x1x1x8x8xf32>
    %97 = vector.shape_cast %96 : vector<1x1x1x8x8xf32> to vector<8x8xf32>
    %c0_118 = arith.constant 0 : index
    %c0_119 = arith.constant 0 : index
    %c2_120 = arith.constant 2 : index
    %c0_121 = arith.constant 0 : index
    %c0_122 = arith.constant 0 : index
    %98 = vector.load %arg11[%c0_118, %c0_119, %c2_120, %c0_121, %c0_122] : memref<2x1x4x16x8xf32, #tpu.memory_space<vmem>>, vector<1x1x1x8x8xf32>
    %99 = vector.shape_cast %98 : vector<1x1x1x8x8xf32> to vector<8x8xf32>
    %100 = vector.shape_cast %97 : vector<8x8xf32> to vector<1x1x1x8x8xf32>
    tpu.vector_store %arg11[%c0_118, %c0_119, %c2_120, %c0_121, %c0_122], %100 {strides = array<i32>} : memref<2x1x4x16x8xf32, #tpu.memory_space<vmem>>, vector<1x1x1x8x8xf32>,
    %c0_123 = arith.constant 0 : index
    %c0_124 = arith.constant 0 : index
    %c2_125 = arith.constant 2 : index
    %c8_126 = arith.constant 8 : index
    %c0_127 = arith.constant 0 : index
    %101 = vector.load %arg11[%c0_123, %c0_124, %c2_125, %c8_126, %c0_127] : memref<2x1x4x16x8xf32, #tpu.memory_space<vmem>>, vector<1x1x1x8x8xf32>
    %102 = vector.shape_cast %101 : vector<1x1x1x8x8xf32> to vector<8x8xf32>
    %103 = vector.shape_cast %94 : vector<8x8xf32> to vector<1x1x1x8x8xf32>
    tpu.vector_store %arg11[%c0_123, %c0_124, %c2_125, %c8_126, %c0_127], %103 {strides = array<i32>} : memref<2x1x4x16x8xf32, #tpu.memory_space<vmem>>, vector<1x1x1x8x8xf32>,
    %c1_128 = arith.constant 1 : index
    %c0_129 = arith.constant 0 : index
    %c2_130 = arith.constant 2 : index
    %c0_131 = arith.constant 0 : index
    %c0_132 = arith.constant 0 : index
    %104 = vector.load %arg3[%c1_128, %c0_129, %c2_130, %c0_131, %c0_132] : memref<2x1x4x8x8xf32, #tpu.memory_space<vmem>>, vector<1x1x1x8x8xf32>
    %105 = vector.shape_cast %104 : vector<1x1x1x8x8xf32> to vector<8x8xf32>
    %c1_133 = arith.constant 1 : index
    %c0_134 = arith.constant 0 : index
    %c2_135 = arith.constant 2 : index
    %c0_136 = arith.constant 0 : index
    %c0_137 = arith.constant 0 : index
    %106 = vector.load %arg11[%c1_133, %c0_134, %c2_135, %c0_136, %c0_137] : memref<2x1x4x16x8xf32, #tpu.memory_space<vmem>>, vector<1x1x1x8x8xf32>
    %107 = vector.shape_cast %106 : vector<1x1x1x8x8xf32> to vector<8x8xf32>
    %108 = vector.shape_cast %105 : vector<8x8xf32> to vector<1x1x1x8x8xf32>
    tpu.vector_store %arg11[%c1_133, %c0_134, %c2_135, %c0_136, %c0_137], %108 {strides = array<i32>} : memref<2x1x4x16x8xf32, #tpu.memory_space<vmem>>, vector<1x1x1x8x8xf32>,
    %c1_138 = arith.constant 1 : index
    %c0_139 = arith.constant 0 : index
    %c2_140 = arith.constant 2 : index
    %c8_141 = arith.constant 8 : index
    %c0_142 = arith.constant 0 : index
    %109 = vector.load %arg11[%c1_138, %c0_139, %c2_140, %c8_141, %c0_142] : memref<2x1x4x16x8xf32, #tpu.memory_space<vmem>>, vector<1x1x1x8x8xf32>
    %110 = vector.shape_cast %109 : vector<1x1x1x8x8xf32> to vector<8x8xf32>
    %111 = vector.shape_cast %95 : vector<8x8xf32> to vector<1x1x1x8x8xf32>
    tpu.vector_store %arg11[%c1_138, %c0_139, %c2_140, %c8_141, %c0_142], %111 {strides = array<i32>} : memref<2x1x4x16x8xf32, #tpu.memory_space<vmem>>, vector<1x1x1x8x8xf32>,
    %c0_143 = arith.constant 0 : index
    %c0_144 = arith.constant 0 : index
    %c2_145 = arith.constant 2 : index
    %c0_146 = arith.constant 0 : index
    %c0_147 = arith.constant 0 : index
    %112 = vector.load %arg11[%c0_143, %c0_144, %c2_145, %c0_146, %c0_147] : memref<2x1x4x16x8xf32, #tpu.memory_space<vmem>>, vector<1x1x1x16x8xf32>
    %113 = vector.shape_cast %112 : vector<1x1x1x16x8xf32> to vector<16x8xf32>
    %c1_148 = arith.constant 1 : index
    %c0_149 = arith.constant 0 : index
    %c2_150 = arith.constant 2 : index
    %c0_151 = arith.constant 0 : index
    %c0_152 = arith.constant 0 : index
    %114 = vector.load %arg11[%c1_148, %c0_149, %c2_150, %c0_151, %c0_152] : memref<2x1x4x16x8xf32, #tpu.memory_space<vmem>>, vector<1x1x1x16x8xf32>
    %115 = vector.shape_cast %114 : vector<1x1x1x16x8xf32> to vector<16x8xf32>
    %116 = vector.extract_strided_slice %7 {offsets = [0, 16], sizes = [8, 8], strides = [1, 1]} : vector<8x32xf32> to vector<8x8xf32>
    %cst_153 = arith.constant dense<0.000000e+00> : vector<8x16xf32>
    %117 = tpu.matmul %116, %113, %cst_153 {dimension_numbers = #tpu.dot_dimension_numbers<[1], [1], [0], [0], [0, 0, 1, 0], [], []>} : vector<8x8xf32>, vector<16x8xf32>, vector<8x16xf32> -> vector<8x16xf32>
    %cst_154 = arith.constant dense<0xFF800000> : vector<8xf32>
    %118 = vector.multi_reduction <maximumf>, %117, %cst_154 [1] : vector<8x16xf32> to vector<8xf32>
    %119 = vector.shape_cast %118 : vector<8xf32> to vector<8x1xf32>
    %120 = vector.broadcast %119 : vector<8x1xf32> to vector<8x16xf32>
    %121 = arith.subf %117, %120 : vector<8x16xf32>
    %122 = math.exp %121 : vector<8x16xf32>
    %cst_155 = arith.constant dense<0.000000e+00> : vector<8xf32>
    %123 = vector.multi_reduction <add>, %122, %cst_155 [1] : vector<8x16xf32> to vector<8xf32>
    %124 = vector.shape_cast %123 : vector<8xf32> to vector<8x1xf32>
    %125 = vector.broadcast %124 : vector<8x1xf32> to vector<8x16xf32>
    %126 = arith.divf %122, %125 : vector<8x16xf32>
    %c0_156 = arith.constant 0 : index
    %c2_157 = arith.constant 2 : index
    %c0_158 = arith.constant 0 : index
    %c0_159 = arith.constant 0 : index
    %127 = vector.load %arg12[%c0_156, %c2_157, %c0_158, %c0_159] : memref<1x4x8x16xf32, #tpu.memory_space<vmem>>, vector<1x1x8x16xf32>
    %128 = vector.shape_cast %127 : vector<1x1x8x16xf32> to vector<8x16xf32>
    %129 = vector.shape_cast %126 : vector<8x16xf32> to vector<1x1x8x16xf32>
    tpu.vector_store %arg12[%c0_156, %c2_157, %c0_158, %c0_159], %129 {strides = array<i32>} : memref<1x4x8x16xf32, #tpu.memory_space<vmem>>, vector<1x1x8x16xf32>,
    %cst_160 = arith.constant dense<0.000000e+00> : vector<8x8xf32>
    %130 = tpu.matmul %126, %115, %cst_160 {dimension_numbers = #tpu.dot_dimension_numbers<[1], [0], [0], [1], [0, 0, 1, 1], [], []>} : vector<8x16xf32>, vector<16x8xf32>, vector<8x8xf32> -> vector<8x8xf32>
    %c0_161 = arith.constant 0 : index
    %c16 = arith.constant 16 : index
    %131 = vector.load %arg10[%c0_161, %c16] : memref<8x32xf32, #tpu.memory_space<vmem>>, vector<8x8xf32>
    tpu.vector_store %arg10[%c0_161, %c16], %130 {strides = array<i32>} : memref<8x32xf32, #tpu.memory_space<vmem>>, vector<8x8xf32>,
    %132 = vector.extract_strided_slice %12 {offsets = [0, 24], sizes = [8, 8], strides = [1, 1]} : vector<8x32xf32> to vector<8x8xf32>
    %133 = vector.extract_strided_slice %17 {offsets = [0, 24], sizes = [8, 8], strides = [1, 1]} : vector<8x32xf32> to vector<8x8xf32>
    %c0_162 = arith.constant 0 : index
    %c0_163 = arith.constant 0 : index
    %c3 = arith.constant 3 : index
    %c0_164 = arith.constant 0 : index
    %c0_165 = arith.constant 0 : index
    %134 = vector.load %arg3[%c0_162, %c0_163, %c3, %c0_164, %c0_165] : memref<2x1x4x8x8xf32, #tpu.memory_space<vmem>>, vector<1x1x1x8x8xf32>
    %135 = vector.shape_cast %134 : vector<1x1x1x8x8xf32> to vector<8x8xf32>
    %c0_166 = arith.constant 0 : index
    %c0_167 = arith.constant 0 : index
    %c3_168 = arith.constant 3 : index
    %c0_169 = arith.constant 0 : index
    %c0_170 = arith.constant 0 : index
    %136 = vector.load %arg11[%c0_166, %c0_167, %c3_168, %c0_169, %c0_170] : memref<2x1x4x16x8xf32, #tpu.memory_space<vmem>>, vector<1x1x1x8x8xf32>
    %137 = vector.shape_cast %136 : vector<1x1x1x8x8xf32> to vector<8x8xf32>
    %138 = vector.shape_cast %135 : vector<8x8xf32> to vector<1x1x1x8x8xf32>
    tpu.vector_store %arg11[%c0_166, %c0_167, %c3_168, %c0_169, %c0_170], %138 {strides = array<i32>} : memref<2x1x4x16x8xf32, #tpu.memory_space<vmem>>, vector<1x1x1x8x8xf32>,
    %c0_171 = arith.constant 0 : index
    %c0_172 = arith.constant 0 : index
    %c3_173 = arith.constant 3 : index
    %c8_174 = arith.constant 8 : index
    %c0_175 = arith.constant 0 : index
    %139 = vector.load %arg11[%c0_171, %c0_172, %c3_173, %c8_174, %c0_175] : memref<2x1x4x16x8xf32, #tpu.memory_space<vmem>>, vector<1x1x1x8x8xf32>
    %140 = vector.shape_cast %139 : vector<1x1x1x8x8xf32> to vector<8x8xf32>
    %141 = vector.shape_cast %132 : vector<8x8xf32> to vector<1x1x1x8x8xf32>
    tpu.vector_store %arg11[%c0_171, %c0_172, %c3_173, %c8_174, %c0_175], %141 {strides = array<i32>} : memref<2x1x4x16x8xf32, #tpu.memory_space<vmem>>, vector<1x1x1x8x8xf32>,
    %c1_176 = arith.constant 1 : index
    %c0_177 = arith.constant 0 : index
    %c3_178 = arith.constant 3 : index
    %c0_179 = arith.constant 0 : index
    %c0_180 = arith.constant 0 : index
    %142 = vector.load %arg3[%c1_176, %c0_177, %c3_178, %c0_179, %c0_180] : memref<2x1x4x8x8xf32, #tpu.memory_space<vmem>>, vector<1x1x1x8x8xf32>
    %143 = vector.shape_cast %142 : vector<1x1x1x8x8xf32> to vector<8x8xf32>
    %c1_181 = arith.constant 1 : index
    %c0_182 = arith.constant 0 : index
    %c3_183 = arith.constant 3 : index
    %c0_184 = arith.constant 0 : index
    %c0_185 = arith.constant 0 : index
    %144 = vector.load %arg11[%c1_181, %c0_182, %c3_183, %c0_184, %c0_185] : memref<2x1x4x16x8xf32, #tpu.memory_space<vmem>>, vector<1x1x1x8x8xf32>
    %145 = vector.shape_cast %144 : vector<1x1x1x8x8xf32> to vector<8x8xf32>
    %146 = vector.shape_cast %143 : vector<8x8xf32> to vector<1x1x1x8x8xf32>
    tpu.vector_store %arg11[%c1_181, %c0_182, %c3_183, %c0_184, %c0_185], %146 {strides = array<i32>} : memref<2x1x4x16x8xf32, #tpu.memory_space<vmem>>, vector<1x1x1x8x8xf32>,
    %c1_186 = arith.constant 1 : index
    %c0_187 = arith.constant 0 : index
    %c3_188 = arith.constant 3 : index
    %c8_189 = arith.constant 8 : index
    %c0_190 = arith.constant 0 : index
    %147 = vector.load %arg11[%c1_186, %c0_187, %c3_188, %c8_189, %c0_190] : memref<2x1x4x16x8xf32, #tpu.memory_space<vmem>>, vector<1x1x1x8x8xf32>
    %148 = vector.shape_cast %147 : vector<1x1x1x8x8xf32> to vector<8x8xf32>
    %149 = vector.shape_cast %133 : vector<8x8xf32> to vector<1x1x1x8x8xf32>
    tpu.vector_store %arg11[%c1_186, %c0_187, %c3_188, %c8_189, %c0_190], %149 {strides = array<i32>} : memref<2x1x4x16x8xf32, #tpu.memory_space<vmem>>, vector<1x1x1x8x8xf32>,
    %c0_191 = arith.constant 0 : index
    %c0_192 = arith.constant 0 : index
    %c3_193 = arith.constant 3 : index
    %c0_194 = arith.constant 0 : index
    %c0_195 = arith.constant 0 : index
    %150 = vector.load %arg11[%c0_191, %c0_192, %c3_193, %c0_194, %c0_195] : memref<2x1x4x16x8xf32, #tpu.memory_space<vmem>>, vector<1x1x1x16x8xf32>
    %151 = vector.shape_cast %150 : vector<1x1x1x16x8xf32> to vector<16x8xf32>
    %c1_196 = arith.constant 1 : index
    %c0_197 = arith.constant 0 : index
    %c3_198 = arith.constant 3 : index
    %c0_199 = arith.constant 0 : index
    %c0_200 = arith.constant 0 : index
    %152 = vector.load %arg11[%c1_196, %c0_197, %c3_198, %c0_199, %c0_200] : memref<2x1x4x16x8xf32, #tpu.memory_space<vmem>>, vector<1x1x1x16x8xf32>
    %153 = vector.shape_cast %152 : vector<1x1x1x16x8xf32> to vector<16x8xf32>
    %154 = vector.extract_strided_slice %7 {offsets = [0, 24], sizes = [8, 8], strides = [1, 1]} : vector<8x32xf32> to vector<8x8xf32>
    %cst_201 = arith.constant dense<0.000000e+00> : vector<8x16xf32>
    %155 = tpu.matmul %154, %151, %cst_201 {dimension_numbers = #tpu.dot_dimension_numbers<[1], [1], [0], [0], [0, 0, 1, 0], [], []>} : vector<8x8xf32>, vector<16x8xf32>, vector<8x16xf32> -> vector<8x16xf32>
    %cst_202 = arith.constant dense<0xFF800000> : vector<8xf32>
    %156 = vector.multi_reduction <maximumf>, %155, %cst_202 [1] : vector<8x16xf32> to vector<8xf32>
    %157 = vector.shape_cast %156 : vector<8xf32> to vector<8x1xf32>
    %158 = vector.broadcast %157 : vector<8x1xf32> to vector<8x16xf32>
    %159 = arith.subf %155, %158 : vector<8x16xf32>
    %160 = math.exp %159 : vector<8x16xf32>
    %cst_203 = arith.constant dense<0.000000e+00> : vector<8xf32>
    %161 = vector.multi_reduction <add>, %160, %cst_203 [1] : vector<8x16xf32> to vector<8xf32>
    %162 = vector.shape_cast %161 : vector<8xf32> to vector<8x1xf32>
    %163 = vector.broadcast %162 : vector<8x1xf32> to vector<8x16xf32>
    %164 = arith.divf %160, %163 : vector<8x16xf32>
    %c0_204 = arith.constant 0 : index
    %c3_205 = arith.constant 3 : index
    %c0_206 = arith.constant 0 : index
    %c0_207 = arith.constant 0 : index
    %165 = vector.load %arg12[%c0_204, %c3_205, %c0_206, %c0_207] : memref<1x4x8x16xf32, #tpu.memory_space<vmem>>, vector<1x1x8x16xf32>
    %166 = vector.shape_cast %165 : vector<1x1x8x16xf32> to vector<8x16xf32>
    %167 = vector.shape_cast %164 : vector<8x16xf32> to vector<1x1x8x16xf32>
    tpu.vector_store %arg12[%c0_204, %c3_205, %c0_206, %c0_207], %167 {strides = array<i32>} : memref<1x4x8x16xf32, #tpu.memory_space<vmem>>, vector<1x1x8x16xf32>,
    %cst_208 = arith.constant dense<0.000000e+00> : vector<8x8xf32>
    %168 = tpu.matmul %164, %153, %cst_208 {dimension_numbers = #tpu.dot_dimension_numbers<[1], [0], [0], [1], [0, 0, 1, 1], [], []>} : vector<8x16xf32>, vector<16x8xf32>, vector<8x8xf32> -> vector<8x8xf32>
    %c0_209 = arith.constant 0 : index
    %c24 = arith.constant 24 : index
    %169 = vector.load %arg10[%c0_209, %c24] : memref<8x32xf32, #tpu.memory_space<vmem>>, vector<8x8xf32>
    tpu.vector_store %arg10[%c0_209, %c24], %168 {strides = array<i32>} : memref<8x32xf32, #tpu.memory_space<vmem>>, vector<8x8xf32>,
    return
  }
  func.func @transform_0(%arg0: i32, %arg1: i32) -> (i32, i32) {
    %c0_i32 = arith.constant 0 : i32
    %c0_i32_0 = arith.constant 0 : i32
    return %arg1, %c0_i32 : i32, i32
  }
  func.func @transform_1(%arg0: i32, %arg1: i32) -> (i32, i32, i32, i32, i32) {
    %c0_i32 = arith.constant 0 : i32
    %c0_i32_0 = arith.constant 0 : i32
    %c0_i32_1 = arith.constant 0 : i32
    %c0_i32_2 = arith.constant 0 : i32
    return %c0_i32, %arg1, %arg0, %c0_i32_0, %c0_i32_1 : i32, i32, i32, i32, i32
  }
  func.func @transform_2(%arg0: i32, %arg1: i32) -> (i32, i32) {
    %c0_i32 = arith.constant 0 : i32
    %c0_i32_0 = arith.constant 0 : i32
    return %c0_i32, %arg0 : i32, i32
  }
  func.func @transform_3(%arg0: i32, %arg1: i32) -> (i32, i32) {
    %c0_i32 = arith.constant 0 : i32
    %c0_i32_0 = arith.constant 0 : i32
    return %c0_i32, %arg0 : i32, i32
  }
  func.func @transform_4(%arg0: i32, %arg1: i32) -> (i32, i32) {
    %c0_i32 = arith.constant 0 : i32
    %c0_i32_0 = arith.constant 0 : i32
    return %c0_i32, %arg0 : i32, i32
  }
  func.func @transform_5(%arg0: i32, %arg1: i32) -> (i32, i32) {
    %c0_i32 = arith.constant 0 : i32
    %c0_i32_0 = arith.constant 0 : i32
    return %c0_i32, %arg0 : i32, i32
  }
  func.func @transform_6(%arg0: i32, %arg1: i32) -> (i32, i32) {
    %c0_i32 = arith.constant 0 : i32
    %c0_i32_0 = arith.constant 0 : i32
    return %c0_i32, %arg0 : i32, i32
  }
  func.func @transform_7(%arg0: i32, %arg1: i32) -> (i32, i32) {
    %c0_i32 = arith.constant 0 : i32
    %c0_i32_0 = arith.constant 0 : i32
    return %c0_i32, %arg0 : i32, i32
  }
  func.func @transform_8(%arg0: i32, %arg1: i32) -> (i32, i32) {
    %c0_i32 = arith.constant 0 : i32
    return %arg1, %arg0 : i32, i32
  }
  func.func @transform_9(%arg0: i32, %arg1: i32) -> (i32, i32, i32, i32, i32) {
    %c0_i32 = arith.constant 0 : i32
    %c0_i32_0 = arith.constant 0 : i32
    %c0_i32_1 = arith.constant 0 : i32
    %c0_i32_2 = arith.constant 0 : i32
    return %c0_i32, %arg1, %arg0, %c0_i32_0, %c0_i32_1 : i32, i32, i32, i32, i32
  }
  func.func @transform_10(%arg0: i32, %arg1: i32) -> (i32, i32, i32, i32) {
    %c0_i32 = arith.constant 0 : i32
    %c0_i32_0 = arith.constant 0 : i32
    %c0_i32_1 = arith.constant 0 : i32
    return %arg1, %arg0, %c0_i32, %c0_i32_0 : i32, i32, i32, i32
  }
}

</mosaic_0001>

<bundles_post_ra>
// kernel: tpu_custom_call.1
= control target key start
LH: loop header
LB: loop body
LE: loop exit
PB: predicated region body
PF: predicated region fallthrough
CT: control target
= control target key end

     0   :  { %s3251_s0 = inlined_call_operand.hbm [shape: f32[16,32], index: 0, kind: input, shape index: {}]   ;;  %s3252_s1 = inlined_call_operand.hbm [shape: f32[2,2,4,8,8], index: 1, kind: input, shape index: {}]   ;;  %s3253_s2 = inlined_call_operand.hbm [shape: f32[32,32], index: 2, kind: input, shape index: {}]   ;;  %s3254_s3 = inlined_call_operand.vmem [shape: f32[1,32], index: 3, kind: input, shape index: {}]   ;;  %s3255_s4 = inlined_call_operand.hbm [shape: f32[32,32], index: 4, kind: input, shape index: {}]   ;;  %s3256_s5 = inlined_call_operand.vmem [shape: f32[1,32], index: 5, kind: input, shape index: {}]   ;;  %s3257_s6 = inlined_call_operand.hbm [shape: f32[32,32], index: 6, kind: input, shape index: {}]   ;;  %s3258_s7 = inlined_call_operand.vmem [shape: f32[1,32], index: 7, kind: input, shape index: {}]   ;;  %s3259_s8 = inlined_call_operand.hbm [shape: f32[16,32], index: 8, kind: output, shape index: {0}]   ;;  %s3260_s9 = inlined_call_operand.vmem [shape: f32[2,2,4,16,8], index: 9, kind: output, shape index: {1}]   ;;  %s3261_s10 = inlined_call_operand.hbm [shape: f32[2,4,8,16], index: 10, kind: output, shape index: {2}]  }
   0x1   :  { %3277 = sst [smem:[#allocation30_spill]] %s3258_s7 }
   0x2   :  { %3278 = sst [smem:[#allocation31_spill]] %s3259_s8 }
   0x3   :  { %3279 = sst [smem:[#allocation32_spill]] %s3260_s9 }
   0x4   :  { %3280 = sst [smem:[#allocation33_spill]] %s3261_s10 }
   0x5   :  { %16 = vsyncpa [#allocation3], 0 }
   0x6   :  { %18 = vsyncpa [#allocation3 + $0x1], 0 }
   0x7   :  { %19 = vsyncpa [#allocation6], 0 }
   0x8   :  { %21 = vsyncpa [#allocation6 + $0x1], 0 }
   0x9   :  { %22 = vsyncpa [#allocation9], 0 }
   0xa   :  { %23 = vsyncpa [#allocation4], 0 }
   0xb   :  { %25 = vsyncpa [#allocation4 + $0x1], 0 }
   0xc   :  { %26 = vsyncpa [#allocation14], 0 }
   0xd   :  { %28 = vsyncpa [#allocation14 + $0x1], 0  ;;  %s2706_s13 = smov 0   ;;  %s2708_s14 = smov 0  }
   0xe   :  { %s2710_s15 = smov 0   ;;  %s2712_s16 = smov 0  }
   0xf   :  { %s2714_s17 = smov 0   ;;  %s2716_s18 = smov 0  }
  0x10 LB: > { %3281 = sst [smem:[#allocation24_spill]] %s2605_s13  ;;  %s2737_s19 = sadd.s32 4294967295, %s2625_s18   ;;  %s2625_s18 = sphi %s2716_s18, %s34_s18   ;;  %s2621_s17 = sphi %s2714_s17, %s3324_s17   ;;  %s2617_s16 = sphi %s2712_s16, %s3323_s16   ;;  %s2613_s15 = sphi %s2710_s15, %s3322_s15   ;;  %s2609_s14 = sphi %s2708_s14, %s3321_s14   ;;  %s2605_s13 = sphi %s2706_s13, %s3320_s13  }
  0x11   : > { %3282 = sst [smem:[#allocation25_spill]] %s2617_s16  ;;  %s1979_s20 = sadd.s32 4294967294, %s2625_s18  }
  0x12   : > { %s43_s21 = sadd.s32 1, %s2621_s17  ;;  %s53_s22 = sadd.s32 1, %s2613_s15 }
  0x13   : > { %p44_p0 = scmp.ge.s32.totalorder %s43_s21, 2  ;;  %p60_p1 = scmp.ne.s32.totalorder %s2613_s15, %s2609_s14 }
  0x14   : > { %p61_p2 = scmp.eq.s32.totalorder %s2625_s18, 0  ;;  %p66_p3 = scmp.ne.s32.totalorder %s2609_s14, %s2605_s13 }
  0x15   : > { %s3326_s21 = smov (%p44_p0, %s43_s21), 0  ;;  %p3266_p5 = scmp.eq.s32.totalorder %s2737_s19, 0 }
  0x16   : > { %3283 = sst [smem:[#allocation26_spill]] %s3326_s21  ;;  %p2749_p4 = por %p61_p2, %p60_p1 }
  0x17   : > { %s50_s24 = ssub.s32 %s2621_s17, %s3326_s21  ;;  %p276_p6 = scmp.eq.s32.totalorder %s2737_s19, 1 }
  0x18   : > { %s3284_s23 = scalar_select %p2749_p4, 1, 0 }
  0x19   : > { %p51_p7 = scmp.eq.s32.totalorder %s50_s24, 0  ;;  %p2759_p8 = por %p3266_p5, %p66_p3 }
  0x1a   : > { %p2763_p9 = por %p276_p6, %p60_p1  ;;  %p282_p10 = scmp.eq.s32.totalorder %s1979_s20, 1 }
  0x1b   : > { %s3285_s25 = scalar_select %p2759_p8, 1, 0 }
  0x1c   : > { %s3286_s26 = scalar_select %p2763_p9, 1, 0 }
  0x1d   : > { %s2768_s27 = scalar_select %p51_p7, %s2613_s15, %s53_s22  }
  0x1e   : > { %3287 = sst [smem:[#allocation27_spill]] %s3286_s26  ;;  %p2770_p11 = por %p282_p10, %p66_p3 }
  0x1f   : > { %3288 = sst [smem:[#allocation28_spill]] %s2768_s27  ;;  %p1980_p12 = scmp.ge.s32.totalorder %s2625_s18, 1 }
  0x20   : > { %s3289_s28 = scalar_select %p2770_p11, 1, 0 }
  0x21   : > { %p345_p13 = scmp.lt.s32.totalorder %s2625_s18, 3  ;;  %s2627_s30 = smov [#allocation8]  }
  0x22   : > { %3290 = sst [smem:[#allocation29_spill]] %s3289_s28  ;;  %s380_s11 = sshll.u32 %s2627_s30, 4  ;;  %s2782_s11 = int_to_ptr.vmem [resolvable:$true] %s380_s11 }
  0x23   : > { %p2776_p0 = pnand %p1980_p12, %p345_p13  ;;  %s2628_s20 = smov [#allocation7]  }
  0x24   : > { %s359_s22 = sshll.u32 %s2628_s20, 4  ;;  %s2629_s24 = smov [#allocation10]   ;;  %s2790_s22 = int_to_ptr.vmem [resolvable:$true] %s359_s22 }
  0x25   : > { %s3291_s29 = scalar_select %p2776_p0, 1, 0 }
  0x26   : > { %p2278_p1 = pneg %p2776_p0  ;;  %s2792_s21 = sshll.u32 %s2629_s24, 4  ;;  %s402_s21 = int_to_ptr.vmem [resolvable:$true] %s2792_s21 }
  0x27   : > { %s2387_s30 = scalar_lea.hbm %s3255_s4, 512 }
  0x28   : > { %p2786_p2 = pnand %p2278_p1, %p3266_p5  ;;  %p2388_p3 = scmp.ne.s32.totalorder %s3255_s4, %s2387_s30 }
  0x29   : > { %p2394_p12 = scmp.lt.u32.totalorder %s2387_s30, %s3255_s4 }
  0x2a   : > { %p2802_p6 = pneg %p2786_p2 }
  0x2c   : > { %p2390_p7 = pnand %p2802_p6, %p2388_p3 }
  0x2e   : > { %p2391_p10 = pneg %p2390_p7 }
  0x30   : > { %p2396_p13 = pnand %p2394_p12, %p2391_p10 }
  0x32   : > { %2399 = shalt.err (!%p2396_p13)
}
  0x33   : > { %s2400_s10 = scalar_lea.vmem %s2782_s11, 512  ;;  %p2408_p9 = scmp.lt.s32.totalorder %s2782_s11, %s2782_s11 }
  0x34   : > { %p2401_p1 = scmp.ne.s32.totalorder %s2782_s11, %s2400_s10  ;;  %p2409_p8 = scmp.lt.s32.totalorder %s2400_s10, %s2400_s10 }
  0x36   : > { %p2403_p5 = pnand %p2401_p1, %p2802_p6  ;;  %p2410_p3 = por %p2409_p8, %p2408_p9 }
  0x38   : > { %p2404_p11 = pneg %p2403_p5 }
  0x3a   : > { %p2411_p7 = pnand %p2410_p3, %p2404_p11 }
  0x3c   : > { %2414 = shalt.err (!%p2411_p7)
}
  0x3d   : > { %s2630_s13 = smov 128   ;;  %s2631_s27 = smov 8  }
  0x3e   : > { %2284 = dma.hbm_to_vmem [thread:$0]  (!%p2786_p2), %s3255_s4, 512, %s2782_s11, [#allocation9], %s2630_s13, %s2630_s13, %s2631_s27  }
  0x3f   : > { %s2415_s10 = scalar_lea.hbm %s3253_s2, 512 }
  0x40   : > { %p2416_p5 = scmp.ne.s32.totalorder %s3253_s2, %s2415_s10  ;;  %p2422_p11 = scmp.lt.u32.totalorder %s2415_s10, %s3253_s2 }
  0x42   : > { %p2418_p8 = pnand %p2416_p5, %p2802_p6 }
  0x44   : > { %p2419_p9 = pneg %p2418_p8 }
  0x46   : > { %p2424_p10 = pnand %p2422_p11, %p2419_p9 }
  0x48   : > { %2427 = shalt.err (!%p2424_p10)
}
  0x49   : > { %s2428_s11 = scalar_lea.vmem %s2790_s22, 512  ;;  %p2436_p3 = scmp.lt.s32.totalorder %s2790_s22, %s2790_s22 }
  0x4a   : > { %p2429_p12 = scmp.ne.s32.totalorder %s2790_s22, %s2428_s11  ;;  %p2437_p7 = scmp.lt.s32.totalorder %s2428_s11, %s2428_s11 }
  0x4c   : > { %p2431_p13 = pnand %p2429_p12, %p2802_p6  ;;  %p2438_p5 = por %p2437_p7, %p2436_p3 }
  0x4e   : > { %p2432_p1 = pneg %p2431_p13 }
  0x50   : > { %p2439_p8 = pnand %p2438_p5, %p2432_p1 }
  0x52   : > { %2442 = shalt.err (!%p2439_p8)
}
  0x53   : > { %2281 = dma.hbm_to_vmem [thread:$0]  (!%p2786_p2), %s3253_s2, 512, %s2790_s22, [#allocation6], %s2630_s13, %s2630_s13, %s2631_s27  }
  0x54   : > { %s2443_s28 = scalar_lea.hbm %s3257_s6, 512 }
  0x55   : > { %p2444_p9 = scmp.ne.s32.totalorder %s3257_s6, %s2443_s28  ;;  %p2450_p12 = scmp.lt.u32.totalorder %s2443_s28, %s3257_s6 }
  0x57   : > { %p2446_p11 = pnand %p2444_p9, %p2802_p6 }
  0x59   : > { %p2447_p10 = pneg %p2446_p11 }
  0x5b   : > { %p2452_p13 = pnand %p2450_p12, %p2447_p10 }
  0x5d   : > { %2455 = shalt.err (!%p2452_p13)
}
  0x5e   : > { %s2456_s11 = scalar_lea.vmem %s402_s21, 512  ;;  %p2464_p5 = scmp.lt.s32.totalorder %s402_s21, %s402_s21 }
  0x5f   : > { %p2457_p1 = scmp.ne.s32.totalorder %s402_s21, %s2456_s11  ;;  %p2465_p8 = scmp.lt.s32.totalorder %s2456_s11, %s2456_s11 }
  0x61   : > { %p2459_p3 = pnand %p2457_p1, %p2802_p6  ;;  %p2466_p0 = por %p2465_p8, %p2464_p5 }
  0x63   : > { %p2460_p7 = pneg %p2459_p3 }
  0x65   : > { %p2467_p4 = pnand %p2466_p0, %p2460_p7 }
  0x67   : > { %2470 = shalt.err (!%p2467_p4)
}
  0x68   : > { %2287 = dma.hbm_to_vmem [thread:$0]  (!%p2786_p2), %s3257_s6, 512, %s402_s21, [#allocation9], %s2630_s13, %s2630_s13, %s2631_s27  }
  0x69   : > { %p3276_p9 = scmp.ge.s32.totalorder %s2625_s18, 2 }
  0x6a   : > { %s2878_s9 = sand.u32 (!%p3276_p9), 1, %s2613_s15   ;;  %s1989_s12 = sshll.u32 (!%p3276_p9), %s2621_s17, 7 }
  0x6b   : > { %417 = sbr.rel (%p3276_p9) target bundleno = 146 (0x92), region = 40  ;;  %s1988_s8 = sshll.u32 (!%p3276_p9), %s2878_s9, 3 }
  0x6c   : > { %s2885_s28 = scalar_lea.hbm (!%p3276_p9), %s3251_s0, %s1989_s12  ;;  %s425_s21 = scalar_lea.vmem (!%p3276_p9), [#allocation2], %s1988_s8 }
  0x6d   : > { %s432_s13 = sshll.u32 (!%p3276_p9), %s425_s21, 4  ;;  %s422_s27 = scalar_lea.sflag (!%p3276_p9), [#allocation3], %s2878_s9  ;;  %s433_s13 = int_to_ptr.vmem [resolvable:$true] %s432_s13 }
  0x6e   : > { %s2471_s30 = scalar_lea.hbm (!%p3276_p9), %s2885_s28, 128  ;;  %p3294_p0 = scmp.ne.s32.totalorder (!%p3276_p9), %s3284_s23, 0 }
  0x6f   : > { %p2472_p4 = scmp.ne.s32.totalorder (!%p3276_p9), %s2885_s28, %s2471_s30  ;;  %s2475_s10 = scalar_lea.hbm (!%p3276_p9), %s3251_s0, 256 }
  0x70   : > { %p2476_p11 = scmp.lt.u32.totalorder (!%p3276_p9), %s2885_s28, %s3251_s0  ;;  %p2477_p10 = scmp.lt.u32.totalorder (!%p3276_p9), %s2475_s10, %s2471_s30 }
  0x71   : > { %p2473_p2 = pnand (!%p3276_p9), %p2472_p4, %p3294_p0  ;;  %p2479_p13 = scmp.lt.u32.totalorder (!%p3276_p9), %s2471_s30, %s2885_s28 }
  0x72   : > { %p2478_p12 = por %p2477_p10, %p2476_p11 }
  0x73   : > { %p2474_p6 = pneg %p2473_p2 }
  0x74   : > { %p2480_p1 = por %p2479_p13, %p2478_p12 }
  0x76   : > { %p2481_p3 = pnand %p2480_p1, %p2474_p6 }
  0x78   : > { %2484 = shalt.err (!%p2481_p3)
}
  0x79   : > { %s2485_s7 = scalar_lea.vmem %s433_s13, 128  ;;  %s2632_s12 = smov [#allocation2]  }
  0x7a   : > { %p2486_p7 = scmp.ne.s32.totalorder %s433_s13, %s2485_s7  ;;  %s2489_s8 = sshll.u32 %s2632_s12, 4  ;;  %s2490_s8 = int_to_ptr.vmem [resolvable:$false] %s2489_s8 }
  0x7b   : > { %s2491_s16 = scalar_lea.vmem %s2490_s8, 256  ;;  %p2492_p4 = scmp.lt.s32.totalorder %s433_s13, %s2490_s8 }
  0x7c   : > { %p2487_p5 = pnand %p2486_p7, %p3294_p0  ;;  %p2493_p2 = scmp.lt.s32.totalorder %s2491_s16, %s2485_s7 }
  0x7e   : > { %p2488_p8 = pneg %p2487_p5  ;;  %p2494_p9 = por %p2493_p2, %p2492_p4 }
  0x80   : > { %p2495_p10 = pnand %p2494_p9, %p2488_p8 }
  0x82   : > { %2498 = shalt.err (!%p2495_p10)
}
  0x83   : > { %2257 = dma.hbm_to_vmem [thread:$0]  (%p3294_p0), %s2885_s28, 128, %s433_s13, %s422_s27  }
  0x84   : > { %s439_s26 = sand.u32 1, %s2625_s18   ;;  %s1990_s21 = sshll.u32 %s2878_s9, 6 }
  0x85   : > { %s2074_s30 = sshll.u32 %s2621_s17, 9  ;;  %s443_s11 = scalar_lea.vmem [#allocation5], %s1990_s21 }
  0x86   : > { %s451_s10 = scalar_lea.hbm %s3252_s1, %s2074_s30  ;;  %s464_s22 = sshll.u32 %s443_s11, 4  ;;  %s465_s22 = int_to_ptr.vmem [resolvable:$true] %s464_s22 }
  0x87   : > { %s2258_s28 = scalar_select %p3294_p0, [#allocation0], [#allocation17] }
  0x88   : > { %s2633_s27 = smov 1024   ;;  %s2634_s7 = smov 512  }
  0x89   : > { %s456_s13 = sld [smem:[%s2258_s28]]   ;;  %s2635_s9 = smov 4  }
  0x8a   : > { %2259 = sst [smem:[#allocation16]] (%p3294_p0), %s2633_s27  ;;  %s2636_s12 = smov 128  }
  0x8b   : > { %2260 = sst [smem:[#allocation16 + $0x1]] (%p3294_p0), %s2634_s7  ;;  %s2637_s8 = smov 8  }
  0x8c   : > { %2261 = sst [smem:[#allocation16 + $0x2]] (%p3294_p0), %s2635_s9  ;;  %s440_s30 = scalar_lea.sflag [#allocation6], %s439_s26 }
  0x8d   : > { %2262 = sst [smem:[#allocation16 + $0x3]] (%p3294_p0), %s2636_s12  ;;  %s2638_s20 = smov [#allocation15]  }
  0x8e   : > { %2263 = sst [smem:[#allocation16 + $0x4]] (%p3294_p0), %s2636_s12 }
  0x8f   : > { %2264 = sst [smem:[#allocation16 + $0x5]] (%p3294_p0), %s2637_s8  ;;  %s1993_s16 = sshll.u32 %s456_s13, 26 }
  0x90   : > { %s1994_s21 = sadd.s32 134217728, %s1993_s16 }
  0x91   : > { %2265 = dma.general (%p3294_p0), %s451_s10, 1024, %s465_s22, %s440_s30, %s2638_s20, [#allocation16], %s1994_s21, 0  }
  0x92 PF: > { %p3295_p9 = scmp.ne.s32.totalorder %s3291_s29, 0 }
  0x93   : > { %s2930_s24 = sand.u32 (!%p3295_p9), 1, %s2609_s14   ;;  %p3296_p6 = scmp.ne.s32.totalorder (!%p3295_p9), %s3285_s25, 0 }
  0x94   : > { %489 = sbr.rel (%p3295_p9) target bundleno = 2505 (0x9c9), region = 52  ;;  %s1996_s11 = sshll.u32 (!%p3295_p9), %s2930_s24, 3 }
  0x95   : > { %s492_s28 = scalar_lea.sflag (!%p3295_p9), [#allocation3], %s2930_s24  ;;  %s2936_s13 = scalar_lea.vmem (!%p3295_p9), [#allocation2], %s1996_s11 }
  0x9b   : > { %2580 = dma.done.wait (%p3296_p6), %s492_s28, 128  }
  0x9c   : > { %2582 = vsyncadd (%p3296_p6), %s492_s28, 4294967168  ;;  %s500_s23 = sand.u32 1, %s2737_s19   ;;  %s1997_s29 = sshll.u32 %s2930_s24, 6 }
  0x9d   : > { %s501_s26 = scalar_lea.sflag [#allocation6], %s500_s23  ;;  %s2944_s10 = scalar_lea.vmem [#allocation5], %s1997_s29 }
  0x9e   : > { %2584 = dma.done.wait (%p3296_p6), %s501_s26, 1024  }
  0x9f   : > { %2586 = vsyncadd (%p3296_p6), %s501_s26, 4294966272  ;;  %p3297_p0 = scmp.eq.s32.totalorder %s2737_s19, 0 }
  0xa1   : > { %2588 = dma.done.wait (%p3297_p0), [#allocation6], 512   ;;  %p3298_p11 = pmov %p3297_p0 }
  0xa2   : > { %p3299_p12 = pmov %p3297_p0 }
  0xa3   : > { %2590 = vsyncadd (%p3298_p11), [#allocation6], 4294966784 }
  0xa4   : > { %2592 = dma.done.wait (%p3299_p12), [#allocation9], 1024   ;;  %p3300_p13 = pmov %p3297_p0 }
  0xa5   : > { %v2639_v0 = vmov 0.0|0.0   ;;  %vm2640_vm0 = vmmov 0   ;;  %v2641_v1 = vmov 0.0   ;;  %v675_v2 = vld [vmem:[#allocation8] sm:$0xff]  ;;  %v676_v3 = vld [vmem:[#allocation8 + $0x8] sm:$0xff]  ;;  %v677_v4 = vld [vmem:[#allocation8 + $0x10] sm:$0xff] }
  0xa6   : > { %2594 = vsyncadd (%p3300_p13), [#allocation9], 4294966272  ;;  %2211 = vmatprep.subr.bf16.mxu1 %v2639_v0  ;;  %2135 = vmatprep.mubr.msk.f32.mxu1 %vm2640_vm0, %v2641_v1  ;;  %v2212_v5 = vpack.c.bf16 %v676_v3, %v675_v2  ;;  %v678_v6 = vld [vmem:[#allocation8 + $0x18] sm:$0xff]  ;;  %v589_v7 = vld [vmem:[#allocation7] sm:$0xff]  ;;  %vm600_vm1 = vcmask 261120   ;;  %s2002_s19 = sshll.u32 %s2930_s24, 7 }
  0xa7   : > { %2205 = vmatprep.subr.bf16.mxu0 %v2639_v0  ;;  %2124 = vmatprep.mubr.msk.f32.mxu0 %vm2640_vm0, %v2641_v1  ;;  %v590_v8 = vld [vmem:[#allocation7 + $0x8] sm:$0xff]  ;;  %v591_v9 = vld [vmem:[#allocation7 + $0x10] sm:$0xff]  ;;  %v592_v10 = vld [vmem:[#allocation7 + $0x18] sm:$0xff]  ;;  %v2215_v11 = vpack.c.bf16 %v678_v6, %v677_v4  ;;  %vm838_vm2 = vcmask 64512   ;;  %s2977_s25 = scalar_lea.vmem [#allocation12], %s2002_s19  ;;  %s2642_s12 = smov 120  }
  0xa8   : > { %2213 = vmatpush3.bf16.msra.mxu1 %v2212_v5  ;;  %v2206_v12 = vpack.c.bf16 %v590_v8, %v589_v7  ;;  %v2209_v13 = vpack.c.bf16 %v592_v10, %v591_v9  ;;  %v588_v14 = vld [vmem:[%s2936_s13] sm:$0xff]  ;;  %v837_v15 = vld [vmem:[%s2944_s10] sm:$0xff]  ;;  %v2019_v16 = vld [vmem:[%s2944_s10 + $0x8] sm:$0xff]  ;;  %s3303_s21 = sld [smem:[#allocation30_spill]]  ;;  %vm929_vm4 = vcmask 130048   ;;  %s2643_s30 = smov 112  }
  0xa9   : > { %2214 = vmatprep.subr.bf16.mxu1 %v2639_v0  ;;  %839 = vst.msk [vmem:[%s2977_s25] sm:$0xff] %vm838_vm2, %v837_v15  ;;  %2020 = vst.msk [vmem:[%s2977_s25 + $0x10] sm:$0xff] %vm838_vm2, %v2019_v16  ;;  %v2006_v17 = vld [vmem:[%s3256_s5] ss:$0 sm:$0xff]  ;;  %v756_v26 = vld [vmem:[#allocation10] sm:$0xff]  ;;  %s2003_s20 = sshll.u32 %s2930_s24, 5 }
  0xaa   : > { %2207 = vmatpush3.bf16.msra.mxu0 %v2206_v12  ;;  %v2004_v19 = vld [vmem:[%s3254_s3] ss:$0 sm:$0xff]  ;;  %v757_v27 = vld [vmem:[#allocation10 + $0x8] sm:$0xff]  ;;  %v759_v31 = vld [vmem:[#allocation10 + $0x18] sm:$0xff]  ;;  %s3074_s28 = scalar_lea.vmem [#allocation13], %s2003_s20  ;;  %s3098_s13 = scalar_lea.vmem [#allocation11], %s1996_s11 }
  0xab   : > { %2208 = vmatprep.subr.bf16.mxu0 %v2639_v0  ;;  %v758_v28 = vld [vmem:[#allocation10 + $0x10] sm:$0xff]  ;;  %v2218_v30 = vpack.c.bf16 %v757_v27, %v756_v26  ;;  %vm3005_vm3 = vmpackc.low %vm838_vm2, %vm838_vm2  ;;  %v2010_v48 = vld [vmem:[%s2944_s10 + $0x20] sm:$0xff]  ;;  %s2644_s11 = smov 104   ;;  %s2645_s23 = smov 8   ;;  %vm1208_vm5 = vcmask 130112   ;;  %vm1400_vm6 = vcmask 195712  }
  0xac   : > { %2216 = vmatpush3.bf16.msra.mxu1 %v2215_v11  ;;  %v2221_v34 = vpack.c.bf16 %v759_v31, %v758_v28  ;;  %2011 = vst.msk [vmem:[%s2977_s25 + $0x40] sm:$0xff] %vm838_vm2, %v2010_v48  ;;  %v2034_v55 = vld [vmem:[%s2944_s10 + $0x10] sm:$0xff]  ;;  %v2022_v61 = vld [vmem:[%s2944_s10 + $0x28] sm:$0xff]  ;;  %s2646_s29 = smov 16   ;;  %s3304_s26 = sld [smem:[#allocation25_spill]]  ;;  %vm1592_vm7 = vcmask 261312  }
  0xad   : > { %2223 = vmatprep.subr.bf16.mxu1 %v2639_v0  ;;  %2035 = vst.msk [vmem:[%s2977_s25 + $0x20] sm:$0xff] %vm838_vm2, %v2034_v55  ;;  %2023 = vst.msk [vmem:[%s2977_s25 + $0x50] sm:$0xff] %vm838_vm2, %v2022_v61  ;;  %v2037_v62 = vld [vmem:[%s2944_s10 + $0x30] sm:$0xff]  ;;  %v2052_v55 = vld [vmem:[%s2944_s10 + $0x38] sm:$0xff]  ;;  %s2647_s19 = smov 24   ;;  %s1618_s27 = sshll.u32 %s3098_s13, 4  ;;  %s3147_s27 = int_to_ptr.vmem [resolvable:$true] %s1618_s27 }
  0xae   : > { %2210 = vmatpush3.bf16.msra.mxu0 %v2209_v13  ;;  %v2008_v41 = vld [vmem:[%s3303_s21] ss:$0 sm:$0xff]  ;;  %2038 = vst.msk [vmem:[%s2977_s25 + $0x60] sm:$0xff] %vm838_vm2, %v2037_v62  ;;  %2053 = vst.msk [vmem:[%s2977_s25 + $0x70] sm:$0xff] %vm838_vm2, %v2052_v55  ;;  %s1595_s16 = scalar_lea.sflag [#allocation4], %s2930_s24  ;;  %s2499_s21 = scalar_lea.vmem %s3147_s27, 128 }
  0xaf   : > { %2136 = vmatmul.mubr.msk.f32.vlgmr.msra.gmra.mrb[0].mxu1 %vm600_vm1, %v588_v14  ;;  %2217 = vmatprep.subr.bf16.mxu0 %v2639_v0  ;;  %p2500_p1 = scmp.ne.s32.totalorder %s3147_s27, %s2499_s21 }
  0xb0   : > { %2153 = vmatprep.mubr.msk.f32.mxu1 %vm2640_vm0, %v2641_v1  ;;  %v846_v29 = vld [vmem:[%s2977_s25] sm:$0xff]  ;;  %v2025_v37 = vld [vmem:[%s2977_s25 + $0x10] sm:$0xff] }
  0xb1   : > { %2125 = vmatmul.mubr.msk.f32.vlgmr.msra.gmra.mrb[0].mxu0 %vm600_vm1, %v588_v14 }
  0xb2   : > { %2146 = vmatprep.mubr.msk.f32.mxu0 %vm2640_vm0, %v2641_v1  ;;  %2219 = vmatpush3.bf16.msra.mxu0 %v2218_v30  ;;  %s2067_s22 = sshll.u32 %s3304_s26, 7 }
  0xb3   : > { %2220 = vmatprep.subr.bf16.mxu0 %v2639_v0  ;;  %v2013_v50 = vld [vmem:[%s2977_s25 + $0x40] sm:$0xff] }
  0xb4   : > { %v2027_v10 = vld [vmem:[%s2977_s25 + $0x50] sm:$0xff] }
  0xb5   : > { %v2042_v12 = vld [vmem:[%s2977_s25 + $0x60] sm:$0xff] }
  0xb6   : > { %2222 = vmatpush3.bf16.msra.mxu0 %v2221_v34 }
  0xb7   : > { %2227 = vmatprep.subr.bf16.mxu0 %v2639_v0 }
  0xb9   : > { %2147 = vmatmul.mubr.msk.f32.vlgmr.msra.gmra.mrb[2].mxu0 %vm600_vm1, %v588_v14 }
  0xba   : > { %2160 = vmatprep.mubr.msk.f32.mxu0 %vm2640_vm0, %v2641_v1 }
 0x182   : > { %v752_v18 = vpop.f32.mrb[0].mxu1 }
 0x183   : > { %v2990_v20 = vadd.f32 %v2006_v17, %v752_v18  ;;  %v2137_v21 = vpop.f32.mrb[1].mxu1 }
 0x184   : > { %v670_v22 = vpop.f32.mrb[0].mxu0 }
 0x185   : > { %840 = vst.msk [vmem:[%s2977_s25 + $0x8] sm:$0xff] %vm838_vm2, %v2990_v20  ;;  %1021 = vrot.lane.b32.xlu0 %v2990_v20, %s2642_s12  ;;  %v671_v23 = vadd.f32 %v2004_v19, %v670_v22  ;;  %v2126_v24 = vpop.f32.mrb[1].mxu0  ;;  %v2040_v19 = vld [vmem:[%s2977_s25 + $0x20] sm:$0xff] }
 0x187   : > { %v2997_v25 = vmul.f32 0.35355338, %v671_v23 }
 0x189   : > { %1038 = vrot.lane.b32.xlu0 %v2997_v25, %s2642_s12 }
 0x18c   : > { %v847_v32 = vld [vmem:[%s2977_s25 + $0x8] sm:$0xff]  ;;  %v833_v42 = vpop.f32.mrb[2].mxu0 }
 0x18d   : > { %v2224_v35 = vpack.c.bf16 %v847_v32, %v846_v29  ;;  %v3034_v43 = vadd.f32 %v2008_v41, %v833_v42  ;;  %v2148_v44 = vpop.f32.mrb[3].mxu0 }
 0x18f   : > { %2226 = vmatpush3.bf16.xpose.msk.msra.mxu1 %vm3005_vm3, %v2224_v35  ;;  %2012 = vst.msk [vmem:[%s2977_s25 + $0x48] sm:$0xff] %vm838_vm2, %v3034_v43 }
 0x190   : > { %2230 = vmatprep.subr.bf16.mxu1 %v2639_v0 }
 0x196   : > { %2154 = vmatmul.mubr.msk.f32.vlgmr.msra.gmra.mrb[2].mxu1 %vm838_vm2, %v2997_v25  ;;  %v2014_v49 = vld [vmem:[%s2977_s25 + $0x48] sm:$0xff] }
 0x197   : > { %2167 = vmatprep.mubr.msk.f32.mxu1 %vm2640_vm0, %v2641_v1  ;;  %v2228_v51 = vpack.c.bf16 %v2014_v49, %v2013_v50 }
 0x199   : > { %2229 = vmatpush3.bf16.msra.mxu0 %v2228_v51 }
 0x19a   : > { %2234 = vmatprep.subr.bf16.mxu0 %v2639_v0 }
 0x1f7   : > { %v1022_v36 = vpop.permute.xlu0 %1021 }
 0x1f8   : > { %2021 = vst.msk [vmem:[%s2977_s25 + $0x18] sm:$0xff] %vm838_vm2, %v1022_v36 }
 0x1fb   : > { %v1039_v40 = vpop.permute.xlu0 %1038 }
 0x1ff   : > { %v2026_v38 = vld [vmem:[%s2977_s25 + $0x18] sm:$0xff] }
 0x200   : > { %v2231_v39 = vpack.c.bf16 %v2026_v38, %v2025_v37 }
 0x202   : > { %2233 = vmatpush3.bf16.xpose.msk.msra.mxu1 %vm3005_vm3, %v2231_v39  ;;  %v2049_v39 = vld [vmem:[%s2944_s10 + $0x18] sm:$0xff]  ;;  %s3305_s10 = sld [smem:[#allocation27_spill]] }
 0x203   : > { %2241 = vmatprep.subr.bf16.mxu1 %v2639_v0  ;;  %2050 = vst.msk [vmem:[%s2977_s25 + $0x30] sm:$0xff] %vm838_vm2, %v2049_v39 }
 0x208   : > { %p3307_p3 = scmp.ne.s32.totalorder %s3305_s10, 0 }
 0x209   : > { %2168 = vmatmul.mubr.msk.f32.vlgmr.msra.gmra.mrb[4].mxu1 %vm838_vm2, %v1039_v40 }
 0x20a   : > { %2188 = vmatprep.mubr.msk.f32.mxu1 %vm2640_vm0, %v2641_v1  ;;  %v2055_v42 = vld [vmem:[%s2977_s25 + $0x30] sm:$0xff]  ;;  %p2501_p7 = pnand %p2500_p1, %p3307_p3 }
 0x20c   : > { %p2502_p5 = pneg %p2501_p7 }
 0x269   : > { %v925_v45 = vpop.f32.mrb[2].mxu1 }
 0x26a   : > { %v2155_v46 = vpop.f32.mrb[3].mxu1  ;;  %v930_v47 = vsel %vm929_vm4, %v925_v45, -inf }
 0x26b   : > { %931 = vmax.xlane.f32.xlu1 %v930_v47 }
 0x2dc   : > { %v1114_v52 = vpop.f32.mrb[4].mxu1 }
 0x2dd   : > { %v2169_v53 = vpop.f32.mrb[5].mxu1  ;;  %v1118_v54 = vsel %vm929_vm4, %v1114_v52, -inf }
 0x2de   : > { %1119 = vmax.xlane.f32.xlu1 %v1118_v54 }
 0x2ef   : > { %1030 = vrot.lane.b32.xlu1 %v3034_v43, %s2642_s12  ;;  %s3306_s12 = sld [smem:[#allocation31_spill]] }
 0x2f3   : > { %1214 = vrot.lane.b32.xlu1 %v2990_v20, %s2643_s30 }
 0x2f5   : > { %s3145_s8 = scalar_lea.hbm %s3306_s12, %s2067_s22 }
 0x2f8   : > { %v932_v56 = vpop.xlane.xlu1 %931 }
 0x2f9   : > { %v933_v57 = vsub.f32 %v925_v45, %v932_v56 }
 0x2fb   : > { %v934_v58 = vmul.f32 1.442695, %v933_v57 }
 0x2fd   : > { %2371 = vpow2.f32 %v934_v58 }
 0x307   : > { %v2372_v59 = vpop.eup %2371 }
 0x308   : > { %v936_v60 = vsel %vm929_vm4, %v2372_v59, 0.0 }
 0x309   : > { %937 = vadd.xlane.f32.xlu0 %v936_v60 }
 0x31f   : > { %1222 = vrot.lane.b32.xlu0 %v3034_v43, %s2643_s30 }
 0x36b   : > { %v1120_v63 = vpop.xlane.xlu1 %1119 }
 0x36c   : > { %v1121_v2 = vsub.f32 %v1114_v52, %v1120_v63 }
 0x36e   : > { %v1122_v3 = vmul.f32 1.442695, %v1121_v2 }
 0x36f   : > { %v1031_v4 = vpop.permute.xlu1 %1030 }
 0x370   : > { %2373 = vpow2.f32 %v1122_v3  ;;  %2024 = vst.msk [vmem:[%s2977_s25 + $0x58] sm:$0xff] %vm838_vm2, %v1031_v4 }
 0x373   : > { %v1215_v5 = vpop.permute.xlu1 %1214 }
 0x374   : > { %2036 = vst.msk [vmem:[%s2977_s25 + $0x28] sm:$0xff] %vm838_vm2, %v1215_v5 }
 0x377   : > { %v2028_v11 = vld [vmem:[%s2977_s25 + $0x58] sm:$0xff] }
 0x378   : > { %v2235_v14 = vpack.c.bf16 %v2028_v11, %v2027_v10 }
 0x37a   : > { %v2374_v6 = vpop.eup %2373 }
 0x37b   : > { %v1124_v7 = vsel %vm929_vm4, %v2374_v6, 0.0  ;;  %v2041_v21 = vld [vmem:[%s2977_s25 + $0x28] sm:$0xff] }
 0x37c   : > { %1125 = vadd.xlane.f32.xlu1 %v1124_v7  ;;  %v2238_v24 = vpack.c.bf16 %v2041_v21, %v2040_v19 }
 0x38d   : > { %1230 = vrot.lane.b32.xlu1 %v2997_v25, %s2643_s30  ;;  %s2648_s30 = smov [#allocation11]  }
 0x38e   : > { %s2503_s20 = sshll.u32 %s2648_s30, 4  ;;  %s2504_s20 = int_to_ptr.vmem [resolvable:$false] %s2503_s20 }
 0x38f   : > { %p2506_p8 = scmp.lt.s32.totalorder %s3147_s27, %s2504_s20 }
 0x396   : > { %v938_v8 = vpop.xlane.xlu0 %937 }
 0x397   : > { %2375 = vrcp.f32 %v938_v8 }
 0x39a   : > { %v1223_v9 = vpop.permute.xlu0 %1222 }
 0x39b   : > { %2039 = vst.msk [vmem:[%s2977_s25 + $0x68] sm:$0xff] %vm838_vm2, %v1223_v9 }
 0x3a1   : > { %v2376_v13 = vpop.eup %2375 }
 0x3a2   : > { %v940_v15 = vmul.f32 %v2376_v13, %v2372_v59  ;;  %v2043_v16 = vld [vmem:[%s2977_s25 + $0x68] sm:$0xff] }
 0x3a3   : > { %v2242_v17 = vpack.c.bf16 %v2043_v16, %v2042_v12 }
 0x3a4   : > { %941 = vst.msk [vmem:[%s3074_s28] sm:$0xff] %vm929_vm4, %v940_v15  ;;  %2161 = vmatmul.mubr.msk.f32.vlgmr.msra.gmra.mrb[4].mxu0 %vm929_vm4, %v940_v15 }
 0x3a5   : > { %2236 = vmatpush3.bf16.msra.mxu0 %v2235_v14  ;;  %2243 = vmatpush3.bf16.msra.mxu1 %v2242_v17 }
 0x3a6   : > { %2174 = vmatprep.mubr.msk.f32.mxu0 %vm2640_vm0, %v2641_v1  ;;  %2237 = vmatprep.subr.bf16.mxu0 %v2639_v0 }
 0x3a7   : > { %2244 = vmatprep.subr.bf16.mxu1 %v2639_v0 }
 0x409   : > { %v1126_v18 = vpop.xlane.xlu1 %1125 }
 0x40a   : > { %2377 = vrcp.f32 %v1126_v18 }
 0x40d   : > { %v1231_v26 = vpop.permute.xlu1 %1230 }
 0x414   : > { %v2378_v22 = vpop.eup %2377 }
 0x415   : > { %v1128_v23 = vmul.f32 %v2378_v22, %v2374_v6 }
 0x417   : > { %2032 = vst.msk [vmem:[%s3074_s28 + $0x8] sm:$0xff] %vm929_vm4, %v1128_v23  ;;  %2175 = vmatmul.mubr.msk.f32.vlgmr.msra.gmra.mrb[6].mxu0 %vm929_vm4, %v1128_v23 }
 0x418   : > { %2240 = vmatpush3.bf16.xpose.msk.msra.mxu0 %vm3005_vm3, %v2238_v24  ;;  %2181 = vmatprep.mubr.msk.f32.mxu0 %vm2640_vm0, %v2641_v1 }
 0x419   : > { %2248 = vmatprep.subr.bf16.mxu0 %v2639_v0 }
 0x41f   : > { %2182 = vmatmul.mubr.msk.f32.vlgmr.msra.gmra.mrb[8].mxu0 %vm838_vm2, %v1231_v26 }
 0x420   : > { %2202 = vmatprep.mubr.msk.f32.mxu0 %vm2640_vm0, %v2641_v1 }
 0x477   : > { %v1011_v27 = vpop.f32.mrb[4].mxu0 }
 0x478   : > { %1015 = vst.msk [vmem:[%s3098_s13] sm:$0xff] %vm838_vm2, %v1011_v27  ;;  %v2162_v28 = vpop.f32.mrb[5].mxu0 }
 0x4ea   : > { %v1200_v29 = vpop.f32.mrb[6].mxu0 }
 0x4eb   : > { %v2176_v30 = vpop.f32.mrb[7].mxu0 }
 0x4f2   : > { %v1306_v31 = vpop.f32.mrb[8].mxu0 }
 0x4f3   : > { %v2183_v0 = vpop.f32.mrb[9].mxu0  ;;  %v1310_v32 = vsel %vm929_vm4, %v1306_v31, -inf }
 0x4f4   : > { %1311 = vmax.xlane.f32.xlu1 %v1310_v32 }
 0x581   : > { %v1312_v34 = vpop.xlane.xlu1 %1311 }
 0x582   : > { %v1313_v35 = vsub.f32 %v1306_v31, %v1312_v34 }
 0x584   : > { %v1314_v36 = vmul.f32 1.442695, %v1313_v35 }
 0x586   : > { %2379 = vpow2.f32 %v1314_v36 }
 0x590   : > { %v2380_v37 = vpop.eup %2379 }
 0x591   : > { %v1316_v38 = vsel %vm929_vm4, %v2380_v37, 0.0 }
 0x592   : > { %1317 = vadd.xlane.f32.xlu0 %v1316_v38 }
 0x5a8   : > { %1406 = vrot.lane.b32.xlu0 %v2990_v20, %s2644_s11 }
 0x5ac   : > { %1422 = vrot.lane.b32.xlu0 %v2997_v25, %s2644_s11 }
 0x61f   : > { %v1318_v40 = vpop.xlane.xlu0 %1317 }
 0x620   : > { %2381 = vrcp.f32 %v1318_v40 }
 0x623   : > { %v1407_v41 = vpop.permute.xlu0 %1406 }
 0x624   : > { %2051 = vst.msk [vmem:[%s2977_s25 + $0x38] sm:$0xff] %vm838_vm2, %v1407_v41 }
 0x627   : > { %v1423_v20 = vpop.permute.xlu0 %1422 }
 0x62a   : > { %v2382_v44 = vpop.eup %2381 }
 0x62b   : > { %v1320_v45 = vmul.f32 %v2382_v44, %v2380_v37  ;;  %v2056_v46 = vld [vmem:[%s2977_s25 + $0x38] sm:$0xff] }
 0x62c   : > { %v2245_v47 = vpack.c.bf16 %v2056_v46, %v2055_v42 }
 0x62d   : > { %2047 = vst.msk [vmem:[%s3074_s28 + $0x10] sm:$0xff] %vm929_vm4, %v1320_v45  ;;  %2189 = vmatmul.mubr.msk.f32.vlgmr.msra.gmra.mrb[6].mxu1 %vm929_vm4, %v1320_v45 }
 0x62e   : > { %2247 = vmatpush3.bf16.xpose.msk.msra.mxu1 %vm3005_vm3, %v2245_v47  ;;  %2195 = vmatprep.mubr.msk.f32.mxu1 %vm2640_vm0, %v2641_v1 }
 0x635   : > { %2196 = vmatmul.mubr.msk.f32.vlgmr.msra.gmra.mrb[8].mxu1 %vm838_vm2, %v1423_v20 }
 0x700   : > { %v1392_v25 = vpop.f32.mrb[6].mxu1 }
 0x701   : > { %v2190_v48 = vpop.f32.mrb[7].mxu1 }
 0x708   : > { %v1498_v49 = vpop.f32.mrb[8].mxu1 }
 0x709   : > { %v2197_v50 = vpop.f32.mrb[9].mxu1  ;;  %v1502_v51 = vsel %vm929_vm4, %v1498_v49, -inf }
 0x70a   : > { %1503 = vmax.xlane.f32.xlu0 %v1502_v51 }
 0x797   : > { %v1504_v52 = vpop.xlane.xlu0 %1503 }
 0x798   : > { %v1505_v53 = vsub.f32 %v1498_v49, %v1504_v52 }
 0x79a   : > { %v1506_v33 = vmul.f32 1.442695, %v1505_v53 }
 0x79c   : > { %2383 = vpow2.f32 %v1506_v33 }
 0x7a6   : > { %v2384_v54 = vpop.eup %2383 }
 0x7a7   : > { %v1508_v1 = vsel %vm929_vm4, %v2384_v54, 0.0 }
 0x7a8   : > { %1509 = vadd.xlane.f32.xlu1 %v1508_v1 }
 0x7b9   : > { %1414 = vrot.lane.b32.xlu1 %v3034_v43, %s2644_s11  ;;  %v2057_v43 = vld [vmem:[%s2977_s25 + $0x70] sm:$0xff]  ;;  %s2505_s11 = scalar_lea.vmem %s2504_s20, 256 }
 0x7ba   : > { %p2507_p4 = scmp.lt.s32.totalorder %s2505_s11, %s2499_s21 }
 0x7bc   : > { %p2508_p2 = por %p2507_p4, %p2506_p8 }
 0x7bd   : > { %1205 = vrot.lane.b32.xlu1 %v1200_v29, %s2645_s23 }
 0x7be   : > { %p2509_p10 = pnand %p2508_p2, %p2502_p5 }
 0x7c1   : > { %1397 = vrot.lane.b32.xlu1 %v1392_v25, %s2646_s29 }
 0x835   : > { %v1510_v56 = vpop.xlane.xlu1 %1509 }
 0x836   : > { %2385 = vrcp.f32 %v1510_v56 }
 0x839   : > { %v1415_v57 = vpop.permute.xlu1 %1414 }
 0x83a   : > { %2054 = vst.msk [vmem:[%s2977_s25 + $0x78] sm:$0xff] %vm838_vm2, %v1415_v57 }
 0x83d   : > { %v1206_v58 = vpop.permute.xlu1 %1205 }
 0x83e   : > { %1209 = vst.msk [vmem:[%s3098_s13] sm:$0xff] %vm1208_vm5, %v1206_v58 }
 0x840   : > { %v2386_v59 = vpop.eup %2385 }
 0x841   : > { %v1512_v60 = vmul.f32 %v2386_v59, %v2384_v54  ;;  %v1398_v61 = vpop.permute.xlu1 %1397  ;;  %v2058_v62 = vld [vmem:[%s2977_s25 + $0x78] sm:$0xff] }
 0x842   : > { %1401 = vst.msk [vmem:[%s3098_s13] sm:$0xff] %vm1400_vm6, %v1398_v61  ;;  %v2249_v63 = vpack.c.bf16 %v2058_v62, %v2057_v43 }
 0x843   : > { %2062 = vst.msk [vmem:[%s3074_s28 + $0x18] sm:$0xff] %vm929_vm4, %v1512_v60 }
 0x844   : > { %2250 = vmatpush3.bf16.msra.mxu0 %v2249_v63 }
 0x847   : > { %2203 = vmatmul.mubr.msk.f32.vlgmr.msra.gmra.mrb[10].mxu0 %vm929_vm4, %v1512_v60 }
 0x91a   : > { %v1584_v2 = vpop.f32.mrb[10].mxu0 }
 0x91b   : > { %1589 = vrot.lane.b32.xlu1 %v1584_v2, %s2647_s19  ;;  %v2204_v3 = vpop.f32.mrb[11].mxu0 }
 0x98d   : > { %v1590_v4 = vpop.permute.xlu1 %1589 }
 0x98e   : > { %1593 = vst.msk [vmem:[%s3098_s13] sm:$0xff] %vm1592_vm7, %v1590_v4 }
 0x98f   : > { %2512 = shalt.err (!%p2509_p10)
}
 0x990   : > { %s2513_s13 = scalar_lea.hbm %s3145_s8, 128  ;;  %s2517_s19 = scalar_lea.hbm %s3306_s12, 256 }
 0x991   : > { %p2514_p9 = scmp.ne.s32.totalorder %s3145_s8, %s2513_s13  ;;  %p2518_p11 = scmp.lt.u32.totalorder %s3145_s8, %s3306_s12 }
 0x992   : > { %p2519_p12 = scmp.lt.u32.totalorder %s2517_s19, %s2513_s13  ;;  %p2521_p1 = scmp.lt.u32.totalorder %s2513_s13, %s3145_s8 }
 0x993   : > { %p2515_p6 = pnand %p2514_p9, %p3307_p3 }
 0x994   : > { %p2520_p13 = por %p2519_p12, %p2518_p11 }
 0x995   : > { %p2516_p0 = pneg %p2515_p6 }
 0x996   : > { %p2522_p7 = por %p2521_p1, %p2520_p13 }
 0x998   : > { %p2523_p5 = pnand %p2522_p7, %p2516_p0 }
 0x99a   : > { %2526 = shalt.err (!%p2523_p5)
}
 0x99b   : > { %2274 = dma.vmem_to_hbm [thread:$0]  (%p3307_p3), %s3147_s27, 128, %s3145_s8, %s1595_s16   ;;  %v1688_v5 = vld [vmem:[%s2977_s25] sm:$0xff] (%p3307_p3)  ;;  %v1690_v6 = vld [vmem:[%s2977_s25 + $0x8] sm:$0xff] (%p3307_p3)  ;;  %v1692_v7 = vld [vmem:[%s2977_s25 + $0x10] sm:$0xff] (%p3307_p3) }
 0x99c   : > { %s1604_s9 = scalar_lea.sflag [#allocation14], %s2930_s24  ;;  %1624 = sbr.rel (!%p3307_p3) target bundleno = 2477 (0x9ad), region = 80  ;;  %v1694_v8 = vld [vmem:[%s2977_s25 + $0x18] sm:$0xff] (%p3307_p3)  ;;  %v1696_v9 = vld [vmem:[%s2977_s25 + $0x20] sm:$0xff] (%p3307_p3)  ;;  %v1698_v10 = vld [vmem:[%s2977_s25 + $0x28] sm:$0xff] (%p3307_p3) }
 0x99d   : > { %s3308_s21 = sld [smem:[#allocation25_spill]] (%p3307_p3)  ;;  %s3309_s8 = sld [smem:[#allocation32_spill]] (%p3307_p3)  ;;  %v1700_v11 = vld [vmem:[%s2977_s25 + $0x30] sm:$0xff] (%p3307_p3)  ;;  %v1702_v12 = vld [vmem:[%s2977_s25 + $0x38] sm:$0xff] (%p3307_p3)  ;;  %v1704_v13 = vld [vmem:[%s2977_s25 + $0x40] sm:$0xff] (%p3307_p3) }
 0x99e   : > { %v1706_v14 = vld [vmem:[%s2977_s25 + $0x48] sm:$0xff] (%p3307_p3)  ;;  %v1708_v15 = vld [vmem:[%s2977_s25 + $0x50] sm:$0xff] (%p3307_p3)  ;;  %v1710_v16 = vld [vmem:[%s2977_s25 + $0x58] sm:$0xff] (%p3307_p3) }
 0x99f   : > { %v1712_v17 = vld [vmem:[%s2977_s25 + $0x60] sm:$0xff] (%p3307_p3)  ;;  %v1714_v18 = vld [vmem:[%s2977_s25 + $0x68] sm:$0xff] (%p3307_p3)  ;;  %v1716_v19 = vld [vmem:[%s2977_s25 + $0x70] sm:$0xff] (%p3307_p3) }
 0x9a0   : > { %v1718_v21 = vld [vmem:[%s2977_s25 + $0x78] sm:$0xff] (%p3307_p3) }
 0x9a3   : > { %s2075_s30 = sshll.u32 %s3308_s21, 6 }
 0x9a4   : > { %s1630_s16 = scalar_lea.vmem %s3309_s8, %s2075_s30 }
 0x9a5   : > { %1689 = vst [vmem:[%s1630_s16] sm:$0xff] %v1688_v5  ;;  %1691 = vst [vmem:[%s1630_s16 + $0x8] sm:$0xff] %v1690_v6 }
 0x9a6   : > { %1693 = vst [vmem:[%s1630_s16 + $0x10] sm:$0xff] %v1692_v7  ;;  %1695 = vst [vmem:[%s1630_s16 + $0x18] sm:$0xff] %v1694_v8 }
 0x9a7   : > { %1697 = vst [vmem:[%s1630_s16 + $0x20] sm:$0xff] %v1696_v9  ;;  %1699 = vst [vmem:[%s1630_s16 + $0x28] sm:$0xff] %v1698_v10 }
 0x9a8   : > { %1701 = vst [vmem:[%s1630_s16 + $0x30] sm:$0xff] %v1700_v11  ;;  %1703 = vst [vmem:[%s1630_s16 + $0x38] sm:$0xff] %v1702_v12 }
 0x9a9   : > { %1705 = vst [vmem:[%s1630_s16 + $0x80] sm:$0xff] %v1704_v13  ;;  %1707 = vst [vmem:[%s1630_s16 + $0x88] sm:$0xff] %v1706_v14 }
 0x9aa   : > { %1709 = vst [vmem:[%s1630_s16 + $0x90] sm:$0xff] %v1708_v15  ;;  %1711 = vst [vmem:[%s1630_s16 + $0x98] sm:$0xff] %v1710_v16 }
 0x9ab   : > { %1713 = vst [vmem:[%s1630_s16 + $0xa0] sm:$0xff] %v1712_v17  ;;  %1715 = vst [vmem:[%s1630_s16 + $0xa8] sm:$0xff] %v1714_v18 }
 0x9ac   : > { %1717 = vst [vmem:[%s1630_s16 + $0xb0] sm:$0xff] %v1716_v19  ;;  %1719 = vst [vmem:[%s1630_s16 + $0xb8] sm:$0xff] %v1718_v21 }
 0x9ad PF: > { %s3310_s10 = sld [smem:[#allocation25_spill]]  ;;  %s3311_s11 = sld [smem:[#allocation27_spill]] }
 0x9ae   : > { %s1734_s29 = sshll.u32 %s3074_s28, 4  ;;  %s3312_s22 = sld [smem:[#allocation33_spill]]  ;;  %s3202_s29 = int_to_ptr.vmem [resolvable:$true] %s1734_s29 }
 0x9af   : > { %s2527_s21 = scalar_lea.vmem %s3202_s29, 512  ;;  %s2649_s25 = smov [#allocation13]  }
 0x9b0   : > { %p2528_p3 = scmp.ne.s32.totalorder %s3202_s29, %s2527_s21  ;;  %s2531_s30 = sshll.u32 %s2649_s25, 4  ;;  %s2532_s30 = int_to_ptr.vmem [resolvable:$false] %s2531_s30 }
 0x9b1   : > { %s2533_s20 = scalar_lea.vmem %s2532_s30, 1024  ;;  %p2534_p10 = scmp.lt.s32.totalorder %s3202_s29, %s2532_s30 }
 0x9b2   : > { %p2535_p9 = scmp.lt.s32.totalorder %s2533_s20, %s2527_s21 }
 0x9b3   : > { %s2076_s13 = sshll.u32 %s3310_s10, 9  ;;  %p3313_p8 = scmp.ne.s32.totalorder %s3311_s11, 0 }
 0x9b4   : > { %s3200_s7 = scalar_lea.hbm %s3312_s22, %s2076_s13  ;;  %p2536_p6 = por %p2535_p9, %p2534_p10 }
 0x9b5   : > { %p2529_p4 = pnand %p2528_p3, %p3313_p8 }
 0x9b7   : > { %p2530_p2 = pneg %p2529_p4 }
 0x9b9   : > { %p2537_p0 = pnand %p2536_p6, %p2530_p2 }
 0x9bb   : > { %2540 = shalt.err (!%p2537_p0)
}
 0x9bc   : > { %s2541_s28 = scalar_lea.hbm %s3200_s7, 512  ;;  %s2545_s16 = scalar_lea.hbm %s3312_s22, 1024 }
 0x9bd   : > { %p2542_p11 = scmp.ne.s32.totalorder %s3200_s7, %s2541_s28  ;;  %p2546_p1 = scmp.lt.u32.totalorder %s3200_s7, %s3312_s22 }
 0x9be   : > { %p2547_p7 = scmp.lt.u32.totalorder %s2545_s16, %s2541_s28  ;;  %p2549_p3 = scmp.lt.u32.totalorder %s2541_s28, %s3200_s7 }
 0x9bf   : > { %p2543_p12 = pnand %p2542_p11, %p3313_p8 }
 0x9c0   : > { %p2548_p5 = por %p2547_p7, %p2546_p1 }
 0x9c1   : > { %p2544_p13 = pneg %p2543_p12 }
 0x9c2   : > { %p2550_p4 = por %p2549_p3, %p2548_p5 }
 0x9c4   : > { %p2551_p2 = pnand %p2550_p4, %p2544_p13 }
 0x9c6   : > { %2554 = shalt.err (!%p2551_p2)
}
 0x9c7   : > { %s2650_s26 = smov 128  }
 0x9c8   : > { %2275 = dma.vmem_to_hbm [thread:$0]  (%p3313_p8), %s3202_s29, 512, %s3200_s7, %s1604_s9, %s2650_s26, %s2650_s26, %s2645_s23  }
 0x9c9 PF: > { %s3314_s19 = sld [smem:[#allocation24_spill]]  ;;  %s3315_s21 = sld [smem:[#allocation29_spill]] }
 0x9ca   : > { %p3317_p9 = scmp.ge.s32.totalorder %s2625_s18, 2 }
 0x9cf   : > { %s1749_s25 = sand.u32 1, %s3314_s19   ;;  %p3316_p10 = scmp.ne.s32.totalorder %s3315_s21, 0 }
 0x9d0   : > { %s1750_s30 = scalar_lea.sflag [#allocation4], %s1749_s25 }
 0x9d1   : > { %p2289_p6 = pnand %p3317_p9, %p3316_p10 }
 0x9d3   : > { %2596 = dma.done.wait (!%p2289_p6), %s1750_s30, 128  }
 0x9d4   : > { %2598 = vsyncadd (!%p2289_p6), %s1750_s30, 4294967168  ;;  %s1766_s20 = scalar_lea.sflag [#allocation14], %s1749_s25 }
 0x9d5   : > { %2600 = dma.done.wait (!%p2289_p6), %s1766_s20, 512  }
 0x9d6   : > { %2602 = vsyncadd (!%p2289_p6), %s1766_s20, 4294966784  ;;  %s34_s18 = sadd.s32 1, %s2625_s18   ;;  %s3318_s24 = sld [smem:[#allocation28_spill]] }
 0x9d7   : > { %p31_p0 = scmp.ge.s32.totalorder %s34_s18, 4   ;;  %s3319_s23 = sld [smem:[#allocation26_spill]] }
 0x9d8   : > { %s3320_s13 = smov %s2609_s14  ;;  %s3321_s14 = smov %s2613_s15 }
 0x9d9   : > { %s3323_s16 = smov %s2621_s17  ;;  %33 = sbr.rel (!%p31_p0) target bundleno = 16 (0x10), region = 223 }
 0x9dc   : > { %s3322_s15 = smov %s3318_s24 }
 0x9dd   : > { %s3324_s17 = smov %s3319_s23 }
 0x9e0   :  { %1771 = vsyncpa [#allocation3], 1 }
 0x9e1   :  { %1773 = vsyncpa [#allocation3 + $0x1], 1 }
 0x9e2   :  { %1774 = vsyncpa [#allocation6], 1 }
 0x9e3   :  { %1776 = vsyncpa [#allocation6 + $0x1], 1 }
 0x9e4   :  { %1777 = vsyncpa [#allocation9], 1 }
 0x9e5   :  { %1778 = vsyncpa [#allocation4], 1 }
 0x9e6   :  { %1780 = vsyncpa [#allocation4 + $0x1], 1 }
 0x9e7   :  { %1781 = vsyncpa [#allocation14], 1 }
 0x9e8   :  { %1783 = vsyncpa [#allocation14 + $0x1], 1 }

</bundles_post_ra>
